<compile_context>
chip_gen: v6e
topology: v6e:2x2x1
jax: 0.10.0
libtpu: 0.0.40
codegen_flags: <defaults>
</compile_context>

<pallas_src>
import jax
import jax.numpy as jnp
from jax.experimental import pallas as pl
from jax.experimental.pallas import tpu as pltpu

DIM_ENCODING = 2
HIDDEN_LAYER_SIZE_2 = 256   # fc1 out
HIDDEN_LAYER_SIZE_1 = 512   # fc2 out
FMNIST_INPUT_SIZE = 784     # fc3 out (28*28)

TB_MAX = 512                # max rows per grid step (sweepable: 512 / 1024)


def _round_up(v, m):
    return (v + m - 1) // m * m


def _choose_tiling(B):
    """Balanced batch tiling: small padding waste + >=2 tiles for v7x megacore."""
    n_tiles = max(1, pl.cdiv(B, TB_MAX))
    if B >= 16:                       # give each v7x TensorCore >= one sublane granule
        n_tiles = max(n_tiles, 2)
    tb = _round_up(pl.cdiv(B, n_tiles), 8)
    return tb, n_tiles


def _decoder_kernel(x_ref, w1_ref, b1_ref, w2_ref, b2_ref, w3_ref, b3_ref, o_ref):
    x = x_ref[...]                              # (TB, D) f32
    w1 = w1_ref[...]                            # (D, 256) f32

    # fc1 + relu: K = dim_encoding is tiny -> broadcast FMAs on the VPU instead
    # of a padded, degenerate-K MXU pass.  f32 throughout (v5e-safe).
    d = x.shape[1]
    h1 = b1_ref[...] + x[:, 0:1] * w1[0:1, :]
    for j in range(1, d):
        h1 = h1 + x[:, j:j + 1] * w1[j:j + 1, :]
    h1 = jnp.maximum(h1, 0.0)                   # (TB, 256) f32

    # fc2 + relu: bf16 MXU inputs, f32 accumulation.
    h2 = jnp.dot(h1.astype(jnp.bfloat16), w2_ref[...],
                 preferred_element_type=jnp.float32)
    h2 = jnp.maximum(h2 + b2_ref[...], 0.0)     # (TB, 512) f32

    # fc3 + sigmoid: bf16 MXU, f32 accumulation; sigmoid via a single EUP tanh:
    # sigmoid(z) = 0.5 * (1 + tanh(z / 2)).
    z = jnp.dot(h2.astype(jnp.bfloat16), w3_ref[...],
                preferred_element_type=jnp.float32)
    z = z + b3_ref[...]
    o_ref[...] = (0.5 * jnp.tanh(0.5 * z) + 0.5).astype(o_ref.dtype)


def vae_decoder_forward(x, params):
    """x: (B, dim_encoding) f32 -> (B, 1, 28, 28) f32."""
    w1, b1, w2, b2, w3, b3 = params
    B, D = x.shape
    H2 = w1.shape[1]        # 256
    H1 = w2.shape[1]        # 512
    OUT = w3.shape[1]       # 784 (full-dim block: no lane padding needed)

    TB, n_tiles = _choose_tiling(B)
    Bp = TB * n_tiles
    xp = jnp.pad(x, ((0, Bp - B), (0, 0)))

    # Weights/biases: constant index_map -> DMA'd once, resident in VMEM while
    # the x-in / out-out DMAs pipeline with MXU work.
    resident = lambda shape: pl.BlockSpec(shape, lambda i: (0, 0))

    cost = pl.CostEstimate(
        flops=2 * Bp * (D * H2 + H2 * H1 + H1 * OUT),
        transcendentals=Bp * OUT,
        bytes_accessed=(xp.size * 4 + w1.size * 4 + b1.size * 4
                        + w2.size * 2 + b2.size * 4
                        + w3.size * 2 + b3.size * 4
                        + Bp * OUT * 2),
    )

    out2d = pl.pallas_call(
        _decoder_kernel,
        out_shape=jax.ShapeDtypeStruct((Bp, OUT), jnp.bfloat16),
        grid_spec=pltpu.PrefetchScalarGridSpec(
            num_scalar_prefetch=0,
            grid=(n_tiles,),
            in_specs=[
                pl.BlockSpec((TB, D), lambda i: (i, 0)),   # x tile per grid step
                resident(w1.shape), resident(b1.shape),
                resident(w2.shape), resident(b2.shape),
                resident(w3.shape), resident(b3.shape),
            ],
            out_specs=pl.BlockSpec((TB, OUT), lambda i: (i, 0)),
        ),
        compiler_params=pltpu.CompilerParams(
            dimension_semantics=("parallel",),  # batch tiles shard across TCs (v7x)
        ),
        cost_estimate=cost,
    )(xp, w1, b1, w2, b2, w3, b3)

    # Glue: drop batch padding, upcast, match torch's x.reshape(-1, 1, 28, 28).
    return out2d[:B].astype(jnp.float32).reshape(-1, 1, 28, 28)


def init_params(key, dim_encoding):
    """Deterministic synthetic parameters. Weights stored as (in, out)."""
    ks = jax.random.split(key, 6)

    def linear(kw, kb, fan_in, fan_out, w_dtype=jnp.float32):
        # PyTorch default Linear init: U(-1/sqrt(fan_in), 1/sqrt(fan_in))
        bound = 1.0 / jnp.sqrt(jnp.float32(fan_in))
        w = jax.random.uniform(kw, (fan_in, fan_out), jnp.float32, -bound, bound)
        b = jax.random.uniform(kb, (1, fan_out), jnp.float32, -bound, bound)
        return w.astype(w_dtype), b

    w1, b1 = linear(ks[0], ks[1], dim_encoding, HIDDEN_LAYER_SIZE_2)
    w2, b2 = linear(ks[2], ks[3], HIDDEN_LAYER_SIZE_2, HIDDEN_LAYER_SIZE_1,
                    w_dtype=jnp.bfloat16)
    w3, b3 = linear(ks[4], ks[5], HIDDEN_LAYER_SIZE_1, FMNIST_INPUT_SIZE,
                    w_dtype=jnp.bfloat16)
    return (w1, b1, w2, b2, w3, b3)


def reference_forward(x, params):
    """f32 reference using the same stored parameters (bf16 weights upcast)."""
    w1, b1, w2, b2, w3, b3 = params
    hp = jax.lax.Precision.HIGHEST
    h1 = jax.nn.relu(jnp.dot(x, w1, precision=hp) + b1)
    h2 = jax.nn.relu(jnp.dot(h1, w2.astype(jnp.float32), precision=hp) + b2)
    y = jax.nn.sigmoid(jnp.dot(h2, w3.astype(jnp.float32), precision=hp) + b3)
    return y.reshape(-1, 1, 28, 28)


if __name__ == "__main__":
    key = jax.random.PRNGKey(0)
    k_params, k_x1, k_x2 = jax.random.split(key, 3)

    params = init_params(k_params, DIM_ENCODING)

    # Case 1: the docstring example -- 6 latent vectors, 2-dim latent space
    # (single-tile path, grid=(1,)).
    B1 = 6
    x1 = jax.random.normal(k_x1, (B1, DIM_ENCODING), jnp.float32)
    out1 = jax.block_until_ready(vae_decoder_forward(x1, params))
    assert out1.shape == (B1, 1, 28, 28), out1.shape
    ref1 = jax.block_until_ready(reference_forward(x1, params))
    err1 = float(jnp.max(jnp.abs(out1 - ref1)))
    # Tolerance accounts for bf16 MXU inputs/weights, bf16 output store, and the
    # tanh-based sigmoid (f32 accumulation throughout).
    assert err1 < 2e-2, err1

    # Case 2: odd batch exercising the balanced multi-tile path (n_tiles=2, padding).
    B2 = 37
    x2 = jax.random.normal(k_x2, (B2, DIM_ENCODING), jnp.float32)
    out2 = jax.block_until_ready(vae_decoder_forward(x2, params))
    assert out2.shape == (B2, 1, 28, 28), out2.shape
    ref2 = jax.block_until_ready(reference_forward(x2, params))
    err2 = float(jnp.max(jnp.abs(out2 - ref2)))
    assert err2 < 2e-2, err2

    print("KERNEL_OK")
</pallas_src>

<mosaic_0001>
module attributes {stable_mosaic.version = 11 : i64} {
  func.func @_decoder_kernel(%arg0: i32, %arg1: memref<8x2xf32, #tpu.memory_space<vmem>>, %arg2: memref<2x256xf32, #tpu.memory_space<vmem>>, %arg3: memref<1x256xf32, #tpu.memory_space<vmem>>, %arg4: memref<256x512xbf16, #tpu.memory_space<vmem>>, %arg5: memref<1x512xf32, #tpu.memory_space<vmem>>, %arg6: memref<512x784xbf16, #tpu.memory_space<vmem>>, %arg7: memref<1x784xf32, #tpu.memory_space<vmem>>, %arg8: memref<8x784xbf16, #tpu.memory_space<vmem>>) attributes {dimension_semantics = [#tpu.dimension_semantics<parallel>], iteration_bounds = array<i64: 1>, scalar_prefetch = 0 : i64, scratch_operands = 0 : i64, tpu.core_type = #tpu.core_type<tc>, window_params = [{transform_indices = @transform_0, window_bounds = array<i64: 8, 2>}, {pipeline_mode = #tpu.pipeline_mode<synchronous>, transform_indices = @transform_1, window_bounds = array<i64: 2, 256>}, {pipeline_mode = #tpu.pipeline_mode<synchronous>, transform_indices = @transform_2, window_bounds = array<i64: 1, 256>}, {pipeline_mode = #tpu.pipeline_mode<synchronous>, transform_indices = @transform_3, window_bounds = array<i64: 256, 512>}, {pipeline_mode = #tpu.pipeline_mode<synchronous>, transform_indices = @transform_4, window_bounds = array<i64: 1, 512>}, {pipeline_mode = #tpu.pipeline_mode<synchronous>, transform_indices = @transform_5, window_bounds = array<i64: 512, 784>}, {pipeline_mode = #tpu.pipeline_mode<synchronous>, transform_indices = @transform_6, window_bounds = array<i64: 1, 784>}, {transform_indices = @transform_7, window_bounds = array<i64: 8, 784>}]} {
    %c0 = arith.constant 0 : index
    %c0_0 = arith.constant 0 : index
    %0 = vector.load %arg1[%c0, %c0_0] : memref<8x2xf32, #tpu.memory_space<vmem>>, vector<8x2xf32>
    %c0_1 = arith.constant 0 : index
    %c0_2 = arith.constant 0 : index
    %1 = vector.load %arg2[%c0_1, %c0_2] : memref<2x256xf32, #tpu.memory_space<vmem>>, vector<2x256xf32>
    %c0_3 = arith.constant 0 : index
    %c0_4 = arith.constant 0 : index
    %2 = vector.load %arg3[%c0_3, %c0_4] : memref<1x256xf32, #tpu.memory_space<vmem>>, vector<1x256xf32>
    %3 = vector.extract_strided_slice %0 {offsets = [0, 0], sizes = [8, 1], strides = [1, 1]} : vector<8x2xf32> to vector<8x1xf32>
    %4 = vector.extract_strided_slice %1 {offsets = [0, 0], sizes = [1, 256], strides = [1, 1]} : vector<2x256xf32> to vector<1x256xf32>
    %5 = vector.broadcast %3 : vector<8x1xf32> to vector<8x256xf32>
    %6 = vector.broadcast %4 : vector<1x256xf32> to vector<8x256xf32>
    %7 = arith.mulf %5, %6 : vector<8x256xf32>
    %8 = vector.broadcast %2 : vector<1x256xf32> to vector<8x256xf32>
    %9 = arith.addf %8, %7 : vector<8x256xf32>
    %10 = vector.extract_strided_slice %0 {offsets = [0, 1], sizes = [8, 1], strides = [1, 1]} : vector<8x2xf32> to vector<8x1xf32>
    %11 = vector.extract_strided_slice %1 {offsets = [1, 0], sizes = [1, 256], strides = [1, 1]} : vector<2x256xf32> to vector<1x256xf32>
    %12 = vector.broadcast %10 : vector<8x1xf32> to vector<8x256xf32>
    %13 = vector.broadcast %11 : vector<1x256xf32> to vector<8x256xf32>
    %14 = arith.mulf %12, %13 : vector<8x256xf32>
    %15 = arith.addf %9, %14 : vector<8x256xf32>
    %cst = arith.constant 0.000000e+00 : f32
    %16 = vector.broadcast %cst : f32 to vector<8x256xf32>
    %17 = arith.maximumf %15, %16 : vector<8x256xf32>
    %18 = arith.truncf %17 : vector<8x256xf32> to vector<8x256xbf16>
    %c0_5 = arith.constant 0 : index
    %c0_6 = arith.constant 0 : index
    %19 = vector.load %arg4[%c0_5, %c0_6] : memref<256x512xbf16, #tpu.memory_space<vmem>>, vector<256x512xbf16>
    %cst_7 = arith.constant dense<0.000000e+00> : vector<8x512xf32>
    %20 = tpu.matmul %18, %19, %cst_7 {dimension_numbers = #tpu.dot_dimension_numbers<[1], [0], [0], [1], [0, 0, 1, 1], [], []>} : vector<8x256xbf16>, vector<256x512xbf16>, vector<8x512xf32> -> vector<8x512xf32>
    %c0_8 = arith.constant 0 : index
    %c0_9 = arith.constant 0 : index
    %21 = vector.load %arg5[%c0_8, %c0_9] : memref<1x512xf32, #tpu.memory_space<vmem>>, vector<1x512xf32>
    %22 = vector.broadcast %21 : vector<1x512xf32> to vector<8x512xf32>
    %23 = arith.addf %20, %22 : vector<8x512xf32>
    %cst_10 = arith.constant 0.000000e+00 : f32
    %24 = vector.broadcast %cst_10 : f32 to vector<8x512xf32>
    %25 = arith.maximumf %23, %24 : vector<8x512xf32>
    %26 = arith.truncf %25 : vector<8x512xf32> to vector<8x512xbf16>
    %c0_11 = arith.constant 0 : index
    %c0_12 = arith.constant 0 : index
    %27 = vector.load %arg6[%c0_11, %c0_12] : memref<512x784xbf16, #tpu.memory_space<vmem>>, vector<512x784xbf16>
    %cst_13 = arith.constant dense<0.000000e+00> : vector<8x784xf32>
    %28 = tpu.matmul %26, %27, %cst_13 {dimension_numbers = #tpu.dot_dimension_numbers<[1], [0], [0], [1], [0, 0, 1, 1], [], []>} : vector<8x512xbf16>, vector<512x784xbf16>, vector<8x784xf32> -> vector<8x784xf32>
    %c0_14 = arith.constant 0 : index
    %c0_15 = arith.constant 0 : index
    %29 = vector.load %arg7[%c0_14, %c0_15] : memref<1x784xf32, #tpu.memory_space<vmem>>, vector<1x784xf32>
    %30 = vector.broadcast %29 : vector<1x784xf32> to vector<8x784xf32>
    %31 = arith.addf %28, %30 : vector<8x784xf32>
    %cst_16 = arith.constant 5.000000e-01 : f32
    %32 = vector.broadcast %cst_16 : f32 to vector<8x784xf32>
    %33 = arith.mulf %32, %31 : vector<8x784xf32>
    %34 = math.tanh %33 : vector<8x784xf32>
    %cst_17 = arith.constant 5.000000e-01 : f32
    %35 = vector.broadcast %cst_17 : f32 to vector<8x784xf32>
    %36 = arith.mulf %35, %34 : vector<8x784xf32>
    %cst_18 = arith.constant 5.000000e-01 : f32
    %37 = vector.broadcast %cst_18 : f32 to vector<8x784xf32>
    %38 = arith.addf %36, %37 : vector<8x784xf32>
    %39 = arith.truncf %38 : vector<8x784xf32> to vector<8x784xbf16>
    %c0_19 = arith.constant 0 : index
    %c0_20 = arith.constant 0 : index
    %40 = vector.load %arg8[%c0_19, %c0_20] : memref<8x784xbf16, #tpu.memory_space<vmem>>, vector<8x784xbf16>
    tpu.vector_store %arg8[%c0_19, %c0_20], %39 {strides = array<i32>} : memref<8x784xbf16, #tpu.memory_space<vmem>>, vector<8x784xbf16>,
    return
  }
  func.func @transform_0(%arg0: i32) -> (i32, i32) {
    %c0_i32 = arith.constant 0 : i32
    %c0_i32_0 = arith.constant 0 : i32
    return %arg0, %c0_i32 : i32, i32
  }
  func.func @transform_1(%arg0: i32) -> (i32, i32) {
    %c0_i32 = arith.constant 0 : i32
    %c0_i32_0 = arith.constant 0 : i32
    %c0_i32_1 = arith.constant 0 : i32
    return %c0_i32, %c0_i32_0 : i32, i32
  }
  func.func @transform_2(%arg0: i32) -> (i32, i32) {
    %c0_i32 = arith.constant 0 : i32
    %c0_i32_0 = arith.constant 0 : i32
    %c0_i32_1 = arith.constant 0 : i32
    return %c0_i32, %c0_i32_0 : i32, i32
  }
  func.func @transform_3(%arg0: i32) -> (i32, i32) {
    %c0_i32 = arith.constant 0 : i32
    %c0_i32_0 = arith.constant 0 : i32
    %c0_i32_1 = arith.constant 0 : i32
    return %c0_i32, %c0_i32_0 : i32, i32
  }
  func.func @transform_4(%arg0: i32) -> (i32, i32) {
    %c0_i32 = arith.constant 0 : i32
    %c0_i32_0 = arith.constant 0 : i32
    %c0_i32_1 = arith.constant 0 : i32
    return %c0_i32, %c0_i32_0 : i32, i32
  }
  func.func @transform_5(%arg0: i32) -> (i32, i32) {
    %c0_i32 = arith.constant 0 : i32
    %c0_i32_0 = arith.constant 0 : i32
    %c0_i32_1 = arith.constant 0 : i32
    return %c0_i32, %c0_i32_0 : i32, i32
  }
  func.func @transform_6(%arg0: i32) -> (i32, i32) {
    %c0_i32 = arith.constant 0 : i32
    %c0_i32_0 = arith.constant 0 : i32
    %c0_i32_1 = arith.constant 0 : i32
    return %c0_i32, %c0_i32_0 : i32, i32
  }
  func.func @transform_7(%arg0: i32) -> (i32, i32) {
    %c0_i32 = arith.constant 0 : i32
    %c0_i32_0 = arith.constant 0 : i32
    return %arg0, %c0_i32 : i32, i32
  }
}

</mosaic_0001>

<bundles_post_ra>
// kernel: tpu_custom_call.1
= control target key start
LH: loop header
LB: loop body
LE: loop exit
PB: predicated region body
PF: predicated region fallthrough
CT: control target
= control target key end

     0   :  { %v3240_v1 = vmov 0   ;;  %v3241_v10 = vmov 1   ;;  %s4233_s0 = inlined_call_operand.vmem [shape: f32[8,2], index: 0, kind: input, shape index: {}]   ;;  %s4234_s1 = inlined_call_operand.vmem [shape: f32[2,256], index: 1, kind: input, shape index: {}]   ;;  %s4235_s2 = inlined_call_operand.vmem [shape: f32[1,256], index: 2, kind: input, shape index: {}]   ;;  %s4236_s3 = inlined_call_operand.vmem [shape: bf16[256,512], index: 3, kind: input, shape index: {}]   ;;  %s4237_s4 = inlined_call_operand.vmem [shape: f32[1,512], index: 4, kind: input, shape index: {}]   ;;  %s4238_s5 = inlined_call_operand.vmem [shape: bf16[512,784], index: 5, kind: input, shape index: {}]   ;;  %s4239_s6 = inlined_call_operand.vmem [shape: f32[1,784], index: 6, kind: input, shape index: {}]   ;;  %s4240_s7 = inlined_call_operand.hbm [shape: bf16[8,784], index: 7, kind: output, shape index: {}]  }
   0x1   :  { %v28_v0 = vld [vmem:[%s4233_s0] sm:$0xff]  ;;  %2786 = vset.pattern.permute.xlu0 %v3240_v1  ;;  %v2790_v3 = vld [vmem:[%s4236_s3 + $0xec] ss:$16 sps:$4 sm:$0xff]   ;;  %v2793_v5 = vld [vmem:[%s4236_s3 + $0xe8] ss:$16 sps:$4 sm:$0xff]  }
   0x2   :  { %v2788_v2 = vld [vmem:[%s4236_s3 + $0xe4] ss:$16 sps:$4 sm:$0xff]   ;;  %33 = vperm.xlu0 %2786, %v28_v0   ;;  %v2792_v4 = vld [vmem:[%s4236_s3 + $0xe0] ss:$16 sps:$4 sm:$0xff]   ;;  %547 = vmatprep.subr.bf16.mxu1 %v2790_v3  ;;  %v2796_v7 = vld [vmem:[%s4236_s3 + $0xcc] ss:$16 sps:$4 sm:$0xff]  }
   0x3   :  { %506 = vmatprep.subr.bf16.mxu0 %v2788_v2  ;;  %v2794_v6 = vld [vmem:[%s4236_s3 + $0xc4] ss:$16 sps:$4 sm:$0xff]   ;;  %548 = vmatpush1.bf16.msra.mxu1 %v2793_v5  ;;  %v2798_v8 = vld [vmem:[%s4236_s3 + $0xc0] ss:$16 sps:$4 sm:$0xff]   ;;  %v2799_v9 = vld [vmem:[%s4236_s3 + $0xc8] ss:$16 sps:$4 sm:$0xff]   ;;  %v37_v5 = vlaneseq }
   0x4   :  { %507 = vmatpush1.bf16.msra.mxu0 %v2792_v4  ;;  %549 = vmatprep.subr.bf16.mxu1 %v2796_v7  ;;  %v2800_v11 = vld [vmem:[%s4236_s3 + $0xa4] ss:$16 sps:$4 sm:$0xff]   ;;  %v2802_v12 = vld [vmem:[%s4236_s3 + $0xac] ss:$16 sps:$4 sm:$0xff]   ;;  %v2804_v13 = vld [vmem:[%s4236_s3 + $0xa0] ss:$16 sps:$4 sm:$0xff]  }
   0x5   :  { %508 = vmatprep.subr.bf16.mxu0 %v2794_v6  ;;  %v2805_v14 = vld [vmem:[%s4236_s3 + $0xa8] ss:$16 sps:$4 sm:$0xff]   ;;  %v2806_v15 = vld [vmem:[%s4236_s3 + $0x84] ss:$16 sps:$4 sm:$0xff]   ;;  %v2808_v16 = vld [vmem:[%s4236_s3 + $0x8c] ss:$16 sps:$4 sm:$0xff]  }
   0x6   :  { %2787 = vset.pattern.permute.xlu0 %v3241_v10  ;;  %v2810_v17 = vld [vmem:[%s4236_s3 + $0x80] ss:$16 sps:$4 sm:$0xff]   ;;  %v2811_v18 = vld [vmem:[%s4236_s3 + $0x88] ss:$16 sps:$4 sm:$0xff]   ;;  %v2812_v19 = vld [vmem:[%s4236_s3 + $0x64] ss:$16 sps:$4 sm:$0xff]  }
   0x7   :  { %71 = vperm.xlu0 %2787, %v28_v0   ;;  %550 = vmatpush1.bf16.msra.mxu1 %v2799_v9  ;;  %v2814_v20 = vld [vmem:[%s4236_s3 + $0x6c] ss:$16 sps:$4 sm:$0xff]   ;;  %v2816_v21 = vld [vmem:[%s4236_s3 + $0x60] ss:$16 sps:$4 sm:$0xff]   ;;  %v2817_v22 = vld [vmem:[%s4236_s3 + $0x68] ss:$16 sps:$4 sm:$0xff]  }
   0x8   :  { %509 = vmatpush1.bf16.msra.mxu0 %v2798_v8  ;;  %551 = vmatprep.subr.bf16.mxu1 %v2802_v12  ;;  %v2818_v23 = vld [vmem:[%s4236_s3 + $0x44] ss:$16 sps:$4 sm:$0xff]   ;;  %v2820_v24 = vld [vmem:[%s4236_s3 + $0x4c] ss:$16 sps:$4 sm:$0xff]   ;;  %v2822_v25 = vld [vmem:[%s4236_s3 + $0x40] ss:$16 sps:$4 sm:$0xff]  }
   0x9   :  { %510 = vmatprep.subr.bf16.mxu0 %v2800_v11  ;;  %v2823_v26 = vld [vmem:[%s4236_s3 + $0x48] ss:$16 sps:$4 sm:$0xff]   ;;  %v2824_v27 = vld [vmem:[%s4236_s3 + $0x24] ss:$16 sps:$4 sm:$0xff]   ;;  %v2826_v28 = vld [vmem:[%s4236_s3 + $0x2c] ss:$16 sps:$4 sm:$0xff]  }
   0xa   :  { %v2828_v29 = vld [vmem:[%s4236_s3 + $0x20] ss:$16 sps:$4 sm:$0xff]   ;;  %v2829_v30 = vld [vmem:[%s4236_s3 + $0x28] ss:$16 sps:$4 sm:$0xff]   ;;  %v2830_v31 = vld [vmem:[%s4236_s3 + $0x4] ss:$16 sps:$4 sm:$0xff]  }
   0xb   :  { %552 = vmatpush1.bf16.msra.mxu1 %v2805_v14  ;;  %v2832_v32 = vld [vmem:[%s4236_s3 + $0xc] ss:$16 sps:$4 sm:$0xff]   ;;  %v2834_v33 = vld [vmem:[%s4236_s3] ss:$16 sps:$4 sm:$0xff]   ;;  %v2835_v34 = vld [vmem:[%s4236_s3 + $0x8] ss:$16 sps:$4 sm:$0xff]  }
   0xc   :  { %511 = vmatpush1.bf16.msra.mxu0 %v2804_v13  ;;  %553 = vmatprep.subr.bf16.mxu1 %v2808_v16  ;;  %v2836_v35 = vld [vmem:[%s4236_s3 + $0x1e4] ss:$16 sps:$4 sm:$0xff]   ;;  %v2838_v36 = vld [vmem:[%s4236_s3 + $0x1ec] ss:$16 sps:$4 sm:$0xff]   ;;  %v2840_v37 = vld [vmem:[%s4236_s3 + $0x1e0] ss:$16 sps:$4 sm:$0xff]  }
   0xd   :  { %512 = vmatprep.subr.bf16.mxu0 %v2806_v15  ;;  %v2841_v38 = vld [vmem:[%s4236_s3 + $0x1e8] ss:$16 sps:$4 sm:$0xff]   ;;  %v2842_v39 = vld [vmem:[%s4236_s3 + $0x1c4] ss:$16 sps:$4 sm:$0xff]   ;;  %v2844_v40 = vld [vmem:[%s4236_s3 + $0x1cc] ss:$16 sps:$4 sm:$0xff]  }
   0xe   :  { %v2846_v41 = vld [vmem:[%s4236_s3 + $0x1c0] ss:$16 sps:$4 sm:$0xff]   ;;  %v2847_v42 = vld [vmem:[%s4236_s3 + $0x1c8] ss:$16 sps:$4 sm:$0xff]   ;;  %v2848_v43 = vld [vmem:[%s4236_s3 + $0x1a4] ss:$16 sps:$4 sm:$0xff]  }
   0xf   :  { %554 = vmatpush1.bf16.msra.mxu1 %v2811_v18  ;;  %v2850_v44 = vld [vmem:[%s4236_s3 + $0x1ac] ss:$16 sps:$4 sm:$0xff]   ;;  %v2852_v45 = vld [vmem:[%s4236_s3 + $0x1a0] ss:$16 sps:$4 sm:$0xff]   ;;  %v2853_v46 = vld [vmem:[%s4236_s3 + $0x1a8] ss:$16 sps:$4 sm:$0xff]  }
  0x10   :  { %513 = vmatpush1.bf16.msra.mxu0 %v2810_v17  ;;  %555 = vmatprep.subr.bf16.mxu1 %v2814_v20  ;;  %v2854_v47 = vld [vmem:[%s4236_s3 + $0x184] ss:$16 sps:$4 sm:$0xff]   ;;  %v2856_v48 = vld [vmem:[%s4236_s3 + $0x18c] ss:$16 sps:$4 sm:$0xff]   ;;  %v2858_v49 = vld [vmem:[%s4236_s3 + $0x180] ss:$16 sps:$4 sm:$0xff]  }
  0x11   :  { %514 = vmatprep.subr.bf16.mxu0 %v2812_v19  ;;  %v2859_v50 = vld [vmem:[%s4236_s3 + $0x188] ss:$16 sps:$4 sm:$0xff]   ;;  %v2860_v51 = vld [vmem:[%s4236_s3 + $0x164] ss:$16 sps:$4 sm:$0xff]   ;;  %v2862_v52 = vld [vmem:[%s4236_s3 + $0x16c] ss:$16 sps:$4 sm:$0xff]  }
  0x12   :  { %v2864_v53 = vld [vmem:[%s4236_s3 + $0x160] ss:$16 sps:$4 sm:$0xff]   ;;  %v2865_v54 = vld [vmem:[%s4236_s3 + $0x168] ss:$16 sps:$4 sm:$0xff]   ;;  %v2866_v55 = vld [vmem:[%s4236_s3 + $0x144] ss:$16 sps:$4 sm:$0xff]  }
  0x13   :  { %556 = vmatpush1.bf16.msra.mxu1 %v2817_v22  ;;  %v2868_v56 = vld [vmem:[%s4236_s3 + $0x14c] ss:$16 sps:$4 sm:$0xff]   ;;  %v2870_v57 = vld [vmem:[%s4236_s3 + $0x140] ss:$16 sps:$4 sm:$0xff]   ;;  %v2871_v58 = vld [vmem:[%s4236_s3 + $0x148] ss:$16 sps:$4 sm:$0xff]  }
  0x14   :  { %515 = vmatpush1.bf16.msra.mxu0 %v2816_v21  ;;  %557 = vmatprep.subr.bf16.mxu1 %v2820_v24  ;;  %v2872_v59 = vld [vmem:[%s4236_s3 + $0x124] ss:$16 sps:$4 sm:$0xff]   ;;  %v2874_v60 = vld [vmem:[%s4236_s3 + $0x12c] ss:$16 sps:$4 sm:$0xff]   ;;  %v2876_v61 = vld [vmem:[%s4236_s3 + $0x120] ss:$16 sps:$4 sm:$0xff]  }
  0x15   :  { %516 = vmatprep.subr.bf16.mxu0 %v2818_v23  ;;  %v2877_v62 = vld [vmem:[%s4236_s3 + $0x128] ss:$16 sps:$4 sm:$0xff]   ;;  %v2878_v63 = vld [vmem:[%s4236_s3 + $0x104] ss:$16 sps:$4 sm:$0xff]   ;;  %v2880_v0 = vld [vmem:[%s4236_s3 + $0x10c] ss:$16 sps:$4 sm:$0xff]  }
  0x16   :  { %v2882_v1 = vld [vmem:[%s4236_s3 + $0x100] ss:$16 sps:$4 sm:$0xff]   ;;  %v2883_v2 = vld [vmem:[%s4236_s3 + $0x108] ss:$16 sps:$4 sm:$0xff]   ;;  %v3484_v6 = vshrl.u32 %v37_v5, 7 }
  0x17   :  { %558 = vmatpush1.bf16.msra.mxu1 %v2823_v26  ;;  %v2886_v3 = vld [vmem:[%s4238_s5 + $0x18c] ss:$28 sps:$4 sm:$0xff]   ;;  %v29_v7 = vld [vmem:[%s4234_s1] sm:$0xf] }
  0x18   :  { %517 = vmatpush1.bf16.msra.mxu0 %v2822_v25  ;;  %559 = vmatprep.subr.bf16.mxu1 %v2826_v28  ;;  %v2889_v4 = vld [vmem:[%s4238_s5 + $0x50c] ss:$28 sps:$4 sm:$0xff]   ;;  %v3490_v8 = vsub.s32 0, %v3484_v6  ;;  %v3493_v9 = vsub.s32 2, %v3484_v6  ;;  %v3498_v12 = vsub.s32 1, %v3484_v6  ;;  %v3501_v13 = vsub.s32 3, %v3484_v6 }
  0x19   :  { %518 = vmatprep.subr.bf16.mxu0 %v2824_v27  ;;  %v30_v14 = vld [vmem:[%s4235_s2] sm:$0x3] }
  0x1a   :  { %v40_v10 = vrot.slane %v29_v7, %v3490_v8  ;;  %v44_v11 = vrot.slane %v29_v7, %v3493_v9  ;;  %v77_v17 = vrot.slane %v29_v7, %v3498_v12  ;;  %v81_v18 = vrot.slane %v29_v7, %v3501_v13 }
  0x1b   :  { %560 = vmatpush1.bf16.msra.mxu1 %v2829_v30  ;;  %v61_v20 = vrot.slane %v30_v14, %v3490_v8  ;;  %v65_v21 = vrot.slane %v30_v14, %v3498_v12 }
  0x1c   :  { %519 = vmatpush1.bf16.msra.mxu0 %v2828_v29  ;;  %561 = vmatprep.subr.bf16.mxu1 %v2832_v32  ;;  %v50_v15 = vrot.slane %v40_v10, %v3490_v8  ;;  %v54_v16 = vrot.slane %v44_v11, %v3490_v8  ;;  %v87_v24 = vrot.slane %v77_v17, %v3498_v12 }
  0x1d   :  { %520 = vmatprep.subr.bf16.mxu0 %v2830_v31  ;;  %v91_v25 = vrot.slane %v81_v18, %v3498_v12 }
  0x1f   :  { %562 = vmatpush1.bf16.msra.mxu1 %v2835_v34 }
  0x20   :  { %521 = vmatpush1.bf16.msra.mxu0 %v2834_v33  ;;  %563 = vmatprep.subr.bf16.mxu1 %v2838_v36  ;;  %v2887_v36 = vld [vmem:[%s4238_s5 + $0x508] ss:$28 sps:$4 sm:$0xff]  }
  0x21   :  { %522 = vmatprep.subr.bf16.mxu0 %v2836_v35  ;;  %v2884_v35 = vld [vmem:[%s4238_s5 + $0x188] ss:$28 sps:$4 sm:$0xff]  }
  0x23   :  { %564 = vmatpush2.bf16.msra.mxu1 %v2841_v38  ;;  %v2895_v38 = vld [vmem:[%s4238_s5 + $0x4d4] ss:$28 sps:$4 sm:$0xff]  }
  0x24   :  { %523 = vmatpush2.bf16.msra.mxu0 %v2840_v37  ;;  %565 = vmatprep.subr.bf16.mxu1 %v2844_v40  ;;  %v2892_v37 = vld [vmem:[%s4238_s5 + $0x154] ss:$28 sps:$4 sm:$0xff]  }
  0x25   :  { %524 = vmatprep.subr.bf16.mxu0 %v2842_v39 }
  0x27   :  { %566 = vmatpush2.bf16.msra.mxu1 %v2847_v42  ;;  %v2893_v42 = vld [vmem:[%s4238_s5 + $0x4d0] ss:$28 sps:$4 sm:$0xff]  }
  0x28   :  { %525 = vmatpush2.bf16.msra.mxu0 %v2846_v41  ;;  %567 = vmatprep.subr.bf16.mxu1 %v2850_v44  ;;  %v2890_v41 = vld [vmem:[%s4238_s5 + $0x150] ss:$28 sps:$4 sm:$0xff]   ;;  %v2901_v44 = vld [vmem:[%s4238_s5 + $0x49c] ss:$28 sps:$4 sm:$0xff]  }
  0x29   :  { %526 = vmatprep.subr.bf16.mxu0 %v2848_v43  ;;  %v2898_v43 = vld [vmem:[%s4238_s5 + $0x11c] ss:$28 sps:$4 sm:$0xff]  }
  0x2b   :  { %568 = vmatpush2.bf16.msra.mxu1 %v2853_v46  ;;  %v2899_v46 = vld [vmem:[%s4238_s5 + $0x498] ss:$28 sps:$4 sm:$0xff]  }
  0x2c   :  { %527 = vmatpush2.bf16.msra.mxu0 %v2852_v45  ;;  %569 = vmatprep.subr.bf16.mxu1 %v2856_v48  ;;  %v2896_v45 = vld [vmem:[%s4238_s5 + $0x118] ss:$28 sps:$4 sm:$0xff]   ;;  %v2907_v48 = vld [vmem:[%s4238_s5 + $0x464] ss:$28 sps:$4 sm:$0xff]  }
  0x2d   :  { %528 = vmatprep.subr.bf16.mxu0 %v2854_v47  ;;  %v2904_v47 = vld [vmem:[%s4238_s5 + $0xe4] ss:$28 sps:$4 sm:$0xff]  }
  0x2f   :  { %570 = vmatpush2.bf16.msra.mxu1 %v2859_v50 }
  0x30   :  { %529 = vmatpush2.bf16.msra.mxu0 %v2858_v49  ;;  %571 = vmatprep.subr.bf16.mxu1 %v2862_v52 }
  0x31   :  { %530 = vmatprep.subr.bf16.mxu0 %v2860_v51 }
  0x33   :  { %572 = vmatpush2.bf16.msra.mxu1 %v2865_v54 }
  0x34   :  { %531 = vmatpush2.bf16.msra.mxu0 %v2864_v53  ;;  %573 = vmatprep.subr.bf16.mxu1 %v2868_v56 }
  0x35   :  { %532 = vmatprep.subr.bf16.mxu0 %v2866_v55 }
  0x37   :  { %574 = vmatpush2.bf16.msra.mxu1 %v2871_v58 }
  0x38   :  { %533 = vmatpush2.bf16.msra.mxu0 %v2870_v57  ;;  %575 = vmatprep.subr.bf16.mxu1 %v2874_v60 }
  0x39   :  { %534 = vmatprep.subr.bf16.mxu0 %v2872_v59 }
  0x3b   :  { %576 = vmatpush2.bf16.msra.mxu1 %v2877_v62 }
  0x3c   :  { %535 = vmatpush2.bf16.msra.mxu0 %v2876_v61  ;;  %577 = vmatprep.subr.bf16.mxu1 %v2880_v0 }
  0x3d   :  { %536 = vmatprep.subr.bf16.mxu0 %v2878_v63 }
  0x3f   :  { %578 = vmatpush2.bf16.msra.mxu1 %v2883_v2 }
  0x40   :  { %537 = vmatpush2.bf16.msra.mxu0 %v2882_v1  ;;  %2082 = vmatprep.subr.bf16.mxu1 %v2889_v4 }
  0x41   :  { %2041 = vmatprep.subr.bf16.mxu0 %v2886_v3 }
  0x7d   :  { %v34_v19 = vpop.permute.xlu0 %33 }
  0x7e   :  { %v55_v22 = vmul.f32 %v50_v15, %v34_v19  ;;  %v56_v23 = vmul.f32 %v54_v16, %v34_v19 }
  0x80   :  { %v68_v27 = vadd.f32 %v61_v20, %v55_v22  ;;  %v69_v28 = vadd.f32 %v65_v21, %v56_v23 }
  0x82   :  { %v72_v26 = vpop.permute.xlu0 %71 }
  0x83   :  { %v92_v29 = vmul.f32 %v87_v24, %v72_v26  ;;  %v93_v30 = vmul.f32 %v91_v25, %v72_v26 }
  0x85   :  { %v94_v31 = vadd.f32 %v92_v29, %v68_v27  ;;  %v95_v32 = vadd.f32 %v93_v30, %v69_v28 }
  0x87   :  { %v96_v33 = vmax.f32 %v94_v31, 0.0  ;;  %v97_v34 = vmax.f32 %v95_v32, 0.0 }
  0x89   :  { %v98_v39 = vpack.c.bf16 %v96_v33, %v96_v33  ;;  %v99_v40 = vpack.c.bf16 %v97_v34, %v97_v34 }
  0x8b   :  { %538 = vmatprep.mubr.bf16.mxu0 %v99_v40  ;;  %579 = vmatprep.mubr.bf16.mxu1 %v99_v40 }
  0x8c   :  { %539 = vmatmul.mubr.bf16.vlgmr.msra.gmra.mxu0 %v98_v39  ;;  %580 = vmatmul.mubr.bf16.vlgmr.msra.gmra.mxu1 %v98_v39 }
  0x8d   :  { %2042 = vmatpush1.bf16.msra.mxu0 %v2884_v35  ;;  %2083 = vmatpush1.bf16.msra.mxu1 %v2887_v36 }
  0x8e   :  { %2043 = vmatprep.subr.bf16.mxu0 %v2892_v37  ;;  %2084 = vmatprep.subr.bf16.mxu1 %v2895_v38 }
  0x91   :  { %2044 = vmatpush1.bf16.msra.mxu0 %v2890_v41  ;;  %2085 = vmatpush1.bf16.msra.mxu1 %v2893_v42 }
  0x92   :  { %2045 = vmatprep.subr.bf16.mxu0 %v2898_v43  ;;  %2086 = vmatprep.subr.bf16.mxu1 %v2901_v44 }
  0x93   :  { %12 = vsyncpa [#allocation3], 0  ;;  %v2902_v49 = vld [vmem:[%s4238_s5 + $0xe0] ss:$28 sps:$4 sm:$0xff]   ;;  %v2910_v51 = vld [vmem:[%s4238_s5 + $0xac] ss:$28 sps:$4 sm:$0xff]  }
  0x94   :  { %v2905_v50 = vld [vmem:[%s4238_s5 + $0x460] ss:$28 sps:$4 sm:$0xff]   ;;  %v2913_v52 = vld [vmem:[%s4238_s5 + $0x42c] ss:$28 sps:$4 sm:$0xff]   ;;  %v2916_v55 = vld [vmem:[%s4238_s5 + $0x74] ss:$28 sps:$4 sm:$0xff]  }
  0x95   :  { %2046 = vmatpush1.bf16.msra.mxu0 %v2896_v45  ;;  %2087 = vmatpush1.bf16.msra.mxu1 %v2899_v46  ;;  %v2908_v53 = vld [vmem:[%s4238_s5 + $0xa8] ss:$28 sps:$4 sm:$0xff]   ;;  %v2919_v56 = vld [vmem:[%s4238_s5 + $0x3f4] ss:$28 sps:$4 sm:$0xff]   ;;  %v2922_v59 = vld [vmem:[%s4238_s5 + $0x3c] ss:$28 sps:$4 sm:$0xff]  }
  0x96   :  { %2047 = vmatprep.subr.bf16.mxu0 %v2904_v47  ;;  %2088 = vmatprep.subr.bf16.mxu1 %v2907_v48  ;;  %v2911_v54 = vld [vmem:[%s4238_s5 + $0x428] ss:$28 sps:$4 sm:$0xff]   ;;  %v2914_v57 = vld [vmem:[%s4238_s5 + $0x70] ss:$28 sps:$4 sm:$0xff]   ;;  %v2925_v60 = vld [vmem:[%s4238_s5 + $0x3bc] ss:$28 sps:$4 sm:$0xff]  }
  0x97   :  { %v2917_v58 = vld [vmem:[%s4238_s5 + $0x3f0] ss:$28 sps:$4 sm:$0xff]   ;;  %v2920_v61 = vld [vmem:[%s4238_s5 + $0x38] ss:$28 sps:$4 sm:$0xff]   ;;  %v2928_v63 = vld [vmem:[%s4238_s5 + $0x4] ss:$28 sps:$4 sm:$0xff]  }
  0x98   :  { %v2923_v62 = vld [vmem:[%s4238_s5 + $0x3b8] ss:$28 sps:$4 sm:$0xff]   ;;  %v2931_v0 = vld [vmem:[%s4238_s5 + $0x384] ss:$28 sps:$4 sm:$0xff]   ;;  %v2934_v3 = vld [vmem:[%s4238_s5 + $0x34c] ss:$28 sps:$4 sm:$0xff]  }
  0x99   :  { %2048 = vmatpush1.bf16.msra.mxu0 %v2902_v49  ;;  %2089 = vmatpush1.bf16.msra.mxu1 %v2905_v50  ;;  %v2926_v1 = vld [vmem:[%s4238_s5] ss:$28 sps:$4 sm:$0xff]   ;;  %v2937_v4 = vld [vmem:[%s4238_s5 + $0x6cc] ss:$28 sps:$4 sm:$0xff]   ;;  %v2940_v10 = vld [vmem:[%s4238_s5 + $0x314] ss:$28 sps:$4 sm:$0xff]  }
  0x9a   :  { %2049 = vmatprep.subr.bf16.mxu0 %v2910_v51  ;;  %2090 = vmatprep.subr.bf16.mxu1 %v2913_v52  ;;  %v2929_v2 = vld [vmem:[%s4238_s5 + $0x380] ss:$28 sps:$4 sm:$0xff]   ;;  %v2932_v5 = vld [vmem:[%s4238_s5 + $0x348] ss:$28 sps:$4 sm:$0xff]   ;;  %v2943_v11 = vld [vmem:[%s4238_s5 + $0x694] ss:$28 sps:$4 sm:$0xff]  }
  0x9b   :  { %v2935_v7 = vld [vmem:[%s4238_s5 + $0x6c8] ss:$28 sps:$4 sm:$0xff]   ;;  %v2938_v14 = vld [vmem:[%s4238_s5 + $0x310] ss:$28 sps:$4 sm:$0xff]   ;;  %v2946_v16 = vld [vmem:[%s4238_s5 + $0x2dc] ss:$28 sps:$4 sm:$0xff]  }
  0x9c   :  { %v2941_v15 = vld [vmem:[%s4238_s5 + $0x690] ss:$28 sps:$4 sm:$0xff]   ;;  %v2949_v17 = vld [vmem:[%s4238_s5 + $0x65c] ss:$28 sps:$4 sm:$0xff]   ;;  %v2952_v20 = vld [vmem:[%s4238_s5 + $0x2a4] ss:$28 sps:$4 sm:$0xff]  }
  0x9d   :  { %2050 = vmatpush1.bf16.msra.mxu0 %v2908_v53  ;;  %2091 = vmatpush1.bf16.msra.mxu1 %v2911_v54  ;;  %v2944_v18 = vld [vmem:[%s4238_s5 + $0x2d8] ss:$28 sps:$4 sm:$0xff]   ;;  %v2955_v21 = vld [vmem:[%s4238_s5 + $0x624] ss:$28 sps:$4 sm:$0xff]   ;;  %v2958_v24 = vld [vmem:[%s4238_s5 + $0x26c] ss:$28 sps:$4 sm:$0xff]  }
  0x9e   :  { %2051 = vmatprep.subr.bf16.mxu0 %v2916_v55  ;;  %2092 = vmatprep.subr.bf16.mxu1 %v2919_v56  ;;  %v2947_v19 = vld [vmem:[%s4238_s5 + $0x658] ss:$28 sps:$4 sm:$0xff]   ;;  %v2950_v22 = vld [vmem:[%s4238_s5 + $0x2a0] ss:$28 sps:$4 sm:$0xff]   ;;  %v2961_v25 = vld [vmem:[%s4238_s5 + $0x5ec] ss:$28 sps:$4 sm:$0xff]  }
  0x9f   :  { %v2953_v23 = vld [vmem:[%s4238_s5 + $0x620] ss:$28 sps:$4 sm:$0xff]   ;;  %v2956_v26 = vld [vmem:[%s4238_s5 + $0x268] ss:$28 sps:$4 sm:$0xff]   ;;  %v2964_v28 = vld [vmem:[%s4238_s5 + $0x234] ss:$28 sps:$4 sm:$0xff]  }
  0xa0   :  { %v2959_v27 = vld [vmem:[%s4238_s5 + $0x5e8] ss:$28 sps:$4 sm:$0xff]   ;;  %v2967_v29 = vld [vmem:[%s4238_s5 + $0x5b4] ss:$28 sps:$4 sm:$0xff]   ;;  %v2970_v32 = vld [vmem:[%s4238_s5 + $0x1fc] ss:$28 sps:$4 sm:$0xff]  }
  0xa1   :  { %2052 = vmatpush1.bf16.msra.mxu0 %v2914_v57  ;;  %2093 = vmatpush1.bf16.msra.mxu1 %v2917_v58  ;;  %v2962_v30 = vld [vmem:[%s4238_s5 + $0x230] ss:$28 sps:$4 sm:$0xff]   ;;  %v2973_v33 = vld [vmem:[%s4238_s5 + $0x57c] ss:$28 sps:$4 sm:$0xff]   ;;  %v2976_v36 = vld [vmem:[%s4238_s5 + $0x1c4] ss:$28 sps:$4 sm:$0xff]  }
  0xa2   :  { %2053 = vmatprep.subr.bf16.mxu0 %v2922_v59  ;;  %2094 = vmatprep.subr.bf16.mxu1 %v2925_v60  ;;  %v2965_v31 = vld [vmem:[%s4238_s5 + $0x5b0] ss:$28 sps:$4 sm:$0xff]   ;;  %v2968_v34 = vld [vmem:[%s4238_s5 + $0x1f8] ss:$28 sps:$4 sm:$0xff]   ;;  %v2979_v37 = vld [vmem:[%s4238_s5 + $0x544] ss:$28 sps:$4 sm:$0xff]  }
  0xa3   :  { %v2971_v35 = vld [vmem:[%s4238_s5 + $0x578] ss:$28 sps:$4 sm:$0xff]   ;;  %v2974_v38 = vld [vmem:[%s4238_s5 + $0x1c0] ss:$28 sps:$4 sm:$0xff]   ;;  %vm2427_vm0 = vcmask 125952  }
  0xa4   :  { %v2977_v39 = vld [vmem:[%s4238_s5 + $0x540] ss:$28 sps:$4 sm:$0xff]   ;;  %v2982_v40 = vld [vmem:[%s4238_s5 + $0x194] ss:$28 sps:$4 sm:$0xff]  }
  0xa5   :  { %2054 = vmatpush1.bf16.msra.mxu0 %v2920_v61  ;;  %2095 = vmatpush1.bf16.msra.mxu1 %v2923_v62  ;;  %v2985_v41 = vld [vmem:[%s4238_s5 + $0x514] ss:$28 sps:$4 sm:$0xff]   ;;  %v164_v42 = vld [vmem:[%s4237_s4] sm:$0xf] }
  0xa6   :  { %2055 = vmatprep.subr.bf16.mxu0 %v2928_v63  ;;  %2096 = vmatprep.subr.bf16.mxu1 %v2931_v0  ;;  %v169_v43 = vrot.slane %v164_v42, %v3490_v8  ;;  %v177_v44 = vrot.slane %v164_v42, %v3493_v9  ;;  %v173_v45 = vrot.slane %v164_v42, %v3498_v12 }
  0xa7   :  { %v181_v46 = vrot.slane %v164_v42, %v3501_v13  ;;  %v3036_v42 = vld [vmem:[%s4238_s5 + $0x31c] ss:$28 sps:$4 sm:$0xff]  }
  0xa9   :  { %2056 = vmatpush1.bf16.msra.mxu0 %v2926_v1  ;;  %2097 = vmatpush1.bf16.msra.mxu1 %v2929_v2  ;;  %v2980_v1 = vld [vmem:[%s4238_s5 + $0x190] ss:$28 sps:$4 sm:$0xff]  }
  0xaa   :  { %2057 = vmatprep.subr.bf16.mxu0 %v2934_v3  ;;  %2098 = vmatprep.subr.bf16.mxu1 %v2937_v4  ;;  %v2983_v2 = vld [vmem:[%s4238_s5 + $0x510] ss:$28 sps:$4 sm:$0xff]  }
  0xad   :  { %2058 = vmatpush2.bf16.msra.mxu0 %v2932_v5  ;;  %2099 = vmatpush2.bf16.msra.mxu1 %v2935_v7  ;;  %v2988_v5 = vld [vmem:[%s4238_s5 + $0x15c] ss:$28 sps:$4 sm:$0xff]  }
  0xae   :  { %2059 = vmatprep.subr.bf16.mxu0 %v2940_v10  ;;  %2100 = vmatprep.subr.bf16.mxu1 %v2943_v11  ;;  %v2991_v7 = vld [vmem:[%s4238_s5 + $0x4dc] ss:$28 sps:$4 sm:$0xff]  }
  0xaf   :  { %v2986_v10 = vld [vmem:[%s4238_s5 + $0x158] ss:$28 sps:$4 sm:$0xff]  }
  0xb0   :  { %v2989_v11 = vld [vmem:[%s4238_s5 + $0x4d8] ss:$28 sps:$4 sm:$0xff]  }
  0xb1   :  { %2060 = vmatpush2.bf16.msra.mxu0 %v2938_v14  ;;  %2101 = vmatpush2.bf16.msra.mxu1 %v2941_v15  ;;  %v2994_v14 = vld [vmem:[%s4238_s5 + $0x124] ss:$28 sps:$4 sm:$0xff]  }
  0xb2   :  { %2061 = vmatprep.subr.bf16.mxu0 %v2946_v16  ;;  %2102 = vmatprep.subr.bf16.mxu1 %v2949_v17  ;;  %v2997_v15 = vld [vmem:[%s4238_s5 + $0x4a4] ss:$28 sps:$4 sm:$0xff]  }
  0xb3   :  { %v2992_v16 = vld [vmem:[%s4238_s5 + $0x120] ss:$28 sps:$4 sm:$0xff]  }
  0xb4   :  { %v2995_v17 = vld [vmem:[%s4238_s5 + $0x4a0] ss:$28 sps:$4 sm:$0xff]  }
  0xb5   :  { %2062 = vmatpush2.bf16.msra.mxu0 %v2944_v18  ;;  %2103 = vmatpush2.bf16.msra.mxu1 %v2947_v19  ;;  %v3000_v18 = vld [vmem:[%s4238_s5 + $0xec] ss:$28 sps:$4 sm:$0xff]  }
  0xb6   :  { %2063 = vmatprep.subr.bf16.mxu0 %v2952_v20  ;;  %2104 = vmatprep.subr.bf16.mxu1 %v2955_v21  ;;  %v3003_v19 = vld [vmem:[%s4238_s5 + $0x46c] ss:$28 sps:$4 sm:$0xff]  }
  0xb7   :  { %v2998_v20 = vld [vmem:[%s4238_s5 + $0xe8] ss:$28 sps:$4 sm:$0xff]  }
  0xb8   :  { %v3001_v21 = vld [vmem:[%s4238_s5 + $0x468] ss:$28 sps:$4 sm:$0xff]  }
  0xb9   :  { %2064 = vmatpush2.bf16.msra.mxu0 %v2950_v22  ;;  %2105 = vmatpush2.bf16.msra.mxu1 %v2953_v23  ;;  %v3006_v22 = vld [vmem:[%s4238_s5 + $0xb4] ss:$28 sps:$4 sm:$0xff]  }
  0xba   :  { %2065 = vmatprep.subr.bf16.mxu0 %v2958_v24  ;;  %2106 = vmatprep.subr.bf16.mxu1 %v2961_v25  ;;  %v3009_v23 = vld [vmem:[%s4238_s5 + $0x434] ss:$28 sps:$4 sm:$0xff]  }
  0xbb   :  { %v3004_v24 = vld [vmem:[%s4238_s5 + $0xb0] ss:$28 sps:$4 sm:$0xff]  }
  0xbc   :  { %v3007_v25 = vld [vmem:[%s4238_s5 + $0x430] ss:$28 sps:$4 sm:$0xff]  }
  0xbd   :  { %2066 = vmatpush2.bf16.msra.mxu0 %v2956_v26  ;;  %2107 = vmatpush2.bf16.msra.mxu1 %v2959_v27  ;;  %v3012_v26 = vld [vmem:[%s4238_s5 + $0x7c] ss:$28 sps:$4 sm:$0xff]  }
  0xbe   :  { %2067 = vmatprep.subr.bf16.mxu0 %v2964_v28  ;;  %2108 = vmatprep.subr.bf16.mxu1 %v2967_v29  ;;  %v3015_v27 = vld [vmem:[%s4238_s5 + $0x3fc] ss:$28 sps:$4 sm:$0xff]  }
  0xbf   :  { %v3010_v28 = vld [vmem:[%s4238_s5 + $0x78] ss:$28 sps:$4 sm:$0xff]  }
  0xc0   :  { %v3013_v29 = vld [vmem:[%s4238_s5 + $0x3f8] ss:$28 sps:$4 sm:$0xff]  }
  0xc1   :  { %2068 = vmatpush2.bf16.msra.mxu0 %v2962_v30  ;;  %2109 = vmatpush2.bf16.msra.mxu1 %v2965_v31  ;;  %v3018_v30 = vld [vmem:[%s4238_s5 + $0x44] ss:$28 sps:$4 sm:$0xff]  }
  0xc2   :  { %2069 = vmatprep.subr.bf16.mxu0 %v2970_v32  ;;  %2110 = vmatprep.subr.bf16.mxu1 %v2973_v33  ;;  %v3021_v31 = vld [vmem:[%s4238_s5 + $0x3c4] ss:$28 sps:$4 sm:$0xff]  }
  0xc3   :  { %v3016_v32 = vld [vmem:[%s4238_s5 + $0x40] ss:$28 sps:$4 sm:$0xff]  }
  0xc4   :  { %v3019_v33 = vld [vmem:[%s4238_s5 + $0x3c0] ss:$28 sps:$4 sm:$0xff]  }
  0xc5   :  { %2070 = vmatpush2.bf16.msra.mxu0 %v2968_v34  ;;  %2111 = vmatpush2.bf16.msra.mxu1 %v2971_v35  ;;  %v3024_v34 = vld [vmem:[%s4238_s5 + $0xc] ss:$28 sps:$4 sm:$0xff]  }
  0xc6   :  { %2071 = vmatprep.subr.bf16.mxu0 %v2976_v36  ;;  %2112 = vmatprep.subr.bf16.mxu1 %v2979_v37  ;;  %v3027_v35 = vld [vmem:[%s4238_s5 + $0x38c] ss:$28 sps:$4 sm:$0xff]  }
  0xc7   :  { %v3022_v36 = vld [vmem:[%s4238_s5 + $0x8] ss:$28 sps:$4 sm:$0xff]  }
  0xc8   :  { %v3025_v37 = vld [vmem:[%s4238_s5 + $0x388] ss:$28 sps:$4 sm:$0xff]  }
  0xc9   :  { %2072 = vmatpush2.bf16.msra.mxu0 %v2974_v38  ;;  %2113 = vmatpush2.bf16.msra.mxu1 %v2977_v39  ;;  %v3030_v38 = vld [vmem:[%s4238_s5 + $0x354] ss:$28 sps:$4 sm:$0xff]  }
  0xca   :  { %2123 = vmatprep.subr.bf16.mxu0 %v2982_v40  ;;  %2164 = vmatprep.subr.bf16.mxu1 %v2985_v41  ;;  %v3033_v39 = vld [vmem:[%s4238_s5 + $0x6d4] ss:$28 sps:$4 sm:$0xff]  }
  0xcb   :  { %v3028_v40 = vld [vmem:[%s4238_s5 + $0x350] ss:$28 sps:$4 sm:$0xff]  }
  0xcc   :  { %v3031_v41 = vld [vmem:[%s4238_s5 + $0x6d0] ss:$28 sps:$4 sm:$0xff]  }
 0x14c   :  { %v540_v47 = vpop.f32.mrf.mxu0  ;;  %v581_v48 = vpop.f32.mrf.mxu1 }
 0x14d   :  { %v541_v49 = vadd.f32 %v540_v47, %v169_v43  ;;  %v582_v50 = vadd.f32 %v581_v48, %v177_v44  ;;  %v3039_v43 = vld [vmem:[%s4238_s5 + $0x69c] ss:$28 sps:$4 sm:$0xff]   ;;  %v3045_v47 = vld [vmem:[%s4238_s5 + $0x664] ss:$28 sps:$4 sm:$0xff]  }
 0x14e   :  { %v542_v51 = vpop.f32.mrf.mxu0  ;;  %v583_v52 = vpop.f32.mrf.mxu1  ;;  %v3034_v44 = vld [vmem:[%s4238_s5 + $0x318] ss:$28 sps:$4 sm:$0xff]   ;;  %v3040_v48 = vld [vmem:[%s4238_s5 + $0x2e0] ss:$28 sps:$4 sm:$0xff]  }
 0x14f   :  { %v543_v53 = vadd.f32 %v542_v51, %v173_v45  ;;  %v584_v54 = vadd.f32 %v583_v52, %v181_v46  ;;  %v588_v55 = vmax.f32 %v541_v49, 0.0  ;;  %v590_v56 = vmax.f32 %v582_v50, 0.0  ;;  %v3037_v45 = vld [vmem:[%s4238_s5 + $0x698] ss:$28 sps:$4 sm:$0xff]   ;;  %v3042_v46 = vld [vmem:[%s4238_s5 + $0x2e4] ss:$28 sps:$4 sm:$0xff]  }
 0x150   :  { %v544_v57 = vpop.f32.mrf.mxu0  ;;  %v585_v58 = vpop.f32.mrf.mxu1  ;;  %v3043_v49 = vld [vmem:[%s4238_s5 + $0x660] ss:$28 sps:$4 sm:$0xff]   ;;  %v3048_v50 = vld [vmem:[%s4238_s5 + $0x2ac] ss:$28 sps:$4 sm:$0xff]  }
 0x151   :  { %v589_v59 = vmax.f32 %v543_v53, 0.0  ;;  %v591_v60 = vmax.f32 %v584_v54, 0.0  ;;  %v3723_v3 = vpack.c.bf16 %v588_v55, %v588_v55  ;;  %v3725_v4 = vpack.c.bf16 %v590_v56, %v590_v56  ;;  %v3051_v51 = vld [vmem:[%s4238_s5 + $0x62c] ss:$28 sps:$4 sm:$0xff]   ;;  %v3054_v54 = vld [vmem:[%s4238_s5 + $0x274] ss:$28 sps:$4 sm:$0xff]  }
 0x152   :  { %v545_v61 = vpop.f32.mrf.mxu0  ;;  %v586_v62 = vpop.f32.mrf.mxu1  ;;  %v3046_v52 = vld [vmem:[%s4238_s5 + $0x2a8] ss:$28 sps:$4 sm:$0xff]   ;;  %v3057_v55 = vld [vmem:[%s4238_s5 + $0x5f4] ss:$28 sps:$4 sm:$0xff]   ;;  %v3060_v58 = vld [vmem:[%s4238_s5 + $0x23c] ss:$28 sps:$4 sm:$0xff]  }
 0x153   :  { %v3713_v63 = vpack.c.bf16 %v589_v59, %v589_v59  ;;  %v3715_v0 = vpack.c.bf16 %v591_v60, %v591_v60  ;;  %v3049_v53 = vld [vmem:[%s4238_s5 + $0x628] ss:$28 sps:$4 sm:$0xff]   ;;  %v3052_v56 = vld [vmem:[%s4238_s5 + $0x270] ss:$28 sps:$4 sm:$0xff]   ;;  %v3063_v59 = vld [vmem:[%s4238_s5 + $0x5bc] ss:$28 sps:$4 sm:$0xff]  }
 0x154   :  { %v3055_v57 = vld [vmem:[%s4238_s5 + $0x5f0] ss:$28 sps:$4 sm:$0xff]   ;;  %v3058_v60 = vld [vmem:[%s4238_s5 + $0x238] ss:$28 sps:$4 sm:$0xff]   ;;  %v3066_v62 = vld [vmem:[%s4238_s5 + $0x204] ss:$28 sps:$4 sm:$0xff]  }
 0x155   :  { %2073 = vmatprep.mubr.bf16.mxu0 %v3713_v63  ;;  %2114 = vmatprep.mubr.bf16.mxu1 %v3715_v0  ;;  %v3061_v61 = vld [vmem:[%s4238_s5 + $0x5b8] ss:$28 sps:$4 sm:$0xff]  }
 0x156   :  { %2074 = vmatmul.mubr.bf16.vlgmr.msra.gmra.mxu0 %v3723_v3  ;;  %2115 = vmatmul.mubr.bf16.vlgmr.msra.gmra.mxu1 %v3725_v4 }
 0x157   :  { %2124 = vmatpush1.bf16.msra.mxu0 %v2980_v1  ;;  %2165 = vmatpush1.bf16.msra.mxu1 %v2983_v2  ;;  %v3069_v1 = vld [vmem:[%s4238_s5 + $0x584] ss:$28 sps:$4 sm:$0xff]  }
 0x158   :  { %2155 = vmatprep.mubr.bf16.mxu0 %v3713_v63  ;;  %2196 = vmatprep.mubr.bf16.mxu1 %v3715_v0  ;;  %v3064_v2 = vld [vmem:[%s4238_s5 + $0x200] ss:$28 sps:$4 sm:$0xff]  }
 0x159   :  { %2125 = vmatprep.subr.bf16.mxu0 %v2988_v5  ;;  %2166 = vmatprep.subr.bf16.mxu1 %v2991_v7  ;;  %v3067_v5 = vld [vmem:[%s4238_s5 + $0x580] ss:$28 sps:$4 sm:$0xff]   ;;  %v3072_v7 = vld [vmem:[%s4238_s5 + $0x1cc] ss:$28 sps:$4 sm:$0xff]  }
 0x15b   :  { %2126 = vmatpush1.bf16.msra.mxu0 %v2986_v10  ;;  %2167 = vmatpush1.bf16.msra.mxu1 %v2989_v11  ;;  %v3075_v10 = vld [vmem:[%s4238_s5 + $0x54c] ss:$28 sps:$4 sm:$0xff]  }
 0x15c   :  { %2127 = vmatprep.subr.bf16.mxu0 %v2994_v14  ;;  %2168 = vmatprep.subr.bf16.mxu1 %v2997_v15  ;;  %v3070_v11 = vld [vmem:[%s4238_s5 + $0x1c8] ss:$28 sps:$4 sm:$0xff]   ;;  %v3078_v15 = vld [vmem:[%s4238_s5 + $0x19c] ss:$28 sps:$4 sm:$0xff]  }
 0x15d   :  { %v3073_v14 = vld [vmem:[%s4238_s5 + $0x548] ss:$28 sps:$4 sm:$0xff]  }
 0x15f   :  { %2128 = vmatpush1.bf16.msra.mxu0 %v2992_v16  ;;  %2169 = vmatpush1.bf16.msra.mxu1 %v2995_v17  ;;  %v3081_v16 = vld [vmem:[%s4238_s5 + $0x51c] ss:$28 sps:$4 sm:$0xff]  }
 0x160   :  { %2129 = vmatprep.subr.bf16.mxu0 %v3000_v18  ;;  %2170 = vmatprep.subr.bf16.mxu1 %v3003_v19  ;;  %v3076_v17 = vld [vmem:[%s4238_s5 + $0x198] ss:$28 sps:$4 sm:$0xff]   ;;  %v3084_v19 = vld [vmem:[%s4238_s5 + $0x164] ss:$28 sps:$4 sm:$0xff]  }
 0x161   :  { %v3079_v18 = vld [vmem:[%s4238_s5 + $0x518] ss:$28 sps:$4 sm:$0xff]  }
 0x163   :  { %2130 = vmatpush1.bf16.msra.mxu0 %v2998_v20  ;;  %2171 = vmatpush1.bf16.msra.mxu1 %v3001_v21  ;;  %v3087_v20 = vld [vmem:[%s4238_s5 + $0x4e4] ss:$28 sps:$4 sm:$0xff]  }
 0x164   :  { %2131 = vmatprep.subr.bf16.mxu0 %v3006_v22  ;;  %2172 = vmatprep.subr.bf16.mxu1 %v3009_v23  ;;  %v3082_v21 = vld [vmem:[%s4238_s5 + $0x160] ss:$28 sps:$4 sm:$0xff]   ;;  %v3090_v23 = vld [vmem:[%s4238_s5 + $0x12c] ss:$28 sps:$4 sm:$0xff]  }
 0x165   :  { %v3085_v22 = vld [vmem:[%s4238_s5 + $0x4e0] ss:$28 sps:$4 sm:$0xff]  }
 0x167   :  { %2132 = vmatpush1.bf16.msra.mxu0 %v3004_v24  ;;  %2173 = vmatpush1.bf16.msra.mxu1 %v3007_v25  ;;  %v3093_v24 = vld [vmem:[%s4238_s5 + $0x4ac] ss:$28 sps:$4 sm:$0xff]  }
 0x168   :  { %2133 = vmatprep.subr.bf16.mxu0 %v3012_v26  ;;  %2174 = vmatprep.subr.bf16.mxu1 %v3015_v27  ;;  %v3088_v25 = vld [vmem:[%s4238_s5 + $0x128] ss:$28 sps:$4 sm:$0xff]   ;;  %v3096_v27 = vld [vmem:[%s4238_s5 + $0xf4] ss:$28 sps:$4 sm:$0xff]  }
 0x169   :  { %v3091_v26 = vld [vmem:[%s4238_s5 + $0x4a8] ss:$28 sps:$4 sm:$0xff]  }
 0x16b   :  { %2134 = vmatpush1.bf16.msra.mxu0 %v3010_v28  ;;  %2175 = vmatpush1.bf16.msra.mxu1 %v3013_v29  ;;  %v3099_v28 = vld [vmem:[%s4238_s5 + $0x474] ss:$28 sps:$4 sm:$0xff]  }
 0x16c   :  { %2135 = vmatprep.subr.bf16.mxu0 %v3018_v30  ;;  %2176 = vmatprep.subr.bf16.mxu1 %v3021_v31  ;;  %v3094_v29 = vld [vmem:[%s4238_s5 + $0xf0] ss:$28 sps:$4 sm:$0xff]   ;;  %v3102_v31 = vld [vmem:[%s4238_s5 + $0xbc] ss:$28 sps:$4 sm:$0xff]  }
 0x16d   :  { %v3097_v30 = vld [vmem:[%s4238_s5 + $0x470] ss:$28 sps:$4 sm:$0xff]  }
 0x16f   :  { %2136 = vmatpush1.bf16.msra.mxu0 %v3016_v32  ;;  %2177 = vmatpush1.bf16.msra.mxu1 %v3019_v33  ;;  %v3105_v32 = vld [vmem:[%s4238_s5 + $0x43c] ss:$28 sps:$4 sm:$0xff]  }
 0x170   :  { %2137 = vmatprep.subr.bf16.mxu0 %v3024_v34  ;;  %2178 = vmatprep.subr.bf16.mxu1 %v3027_v35  ;;  %v3100_v33 = vld [vmem:[%s4238_s5 + $0xb8] ss:$28 sps:$4 sm:$0xff]   ;;  %v3108_v35 = vld [vmem:[%s4238_s5 + $0x84] ss:$28 sps:$4 sm:$0xff]  }
 0x171   :  { %v3103_v34 = vld [vmem:[%s4238_s5 + $0x438] ss:$28 sps:$4 sm:$0xff]  }
 0x173   :  { %2138 = vmatpush1.bf16.msra.mxu0 %v3022_v36  ;;  %2179 = vmatpush1.bf16.msra.mxu1 %v3025_v37  ;;  %v3111_v36 = vld [vmem:[%s4238_s5 + $0x404] ss:$28 sps:$4 sm:$0xff]  }
 0x174   :  { %2139 = vmatprep.subr.bf16.mxu0 %v3030_v38  ;;  %2180 = vmatprep.subr.bf16.mxu1 %v3033_v39  ;;  %v3106_v37 = vld [vmem:[%s4238_s5 + $0x80] ss:$28 sps:$4 sm:$0xff]   ;;  %v3114_v39 = vld [vmem:[%s4238_s5 + $0x4c] ss:$28 sps:$4 sm:$0xff]  }
 0x175   :  { %v3109_v38 = vld [vmem:[%s4238_s5 + $0x400] ss:$28 sps:$4 sm:$0xff]  }
 0x177   :  { %2140 = vmatpush2.bf16.msra.mxu0 %v3028_v40  ;;  %2181 = vmatpush2.bf16.msra.mxu1 %v3031_v41  ;;  %v3117_v40 = vld [vmem:[%s4238_s5 + $0x3cc] ss:$28 sps:$4 sm:$0xff]  }
 0x178   :  { %2141 = vmatprep.subr.bf16.mxu0 %v3036_v42  ;;  %2182 = vmatprep.subr.bf16.mxu1 %v3039_v43  ;;  %v3112_v41 = vld [vmem:[%s4238_s5 + $0x48] ss:$28 sps:$4 sm:$0xff]   ;;  %v3120_v43 = vld [vmem:[%s4238_s5 + $0x14] ss:$28 sps:$4 sm:$0xff]  }
 0x179   :  { %v3115_v42 = vld [vmem:[%s4238_s5 + $0x3c8] ss:$28 sps:$4 sm:$0xff]  }
 0x17b   :  { %2142 = vmatpush2.bf16.msra.mxu0 %v3034_v44  ;;  %2183 = vmatpush2.bf16.msra.mxu1 %v3037_v45  ;;  %v3123_v44 = vld [vmem:[%s4238_s5 + $0x394] ss:$28 sps:$4 sm:$0xff]  }
 0x17c   :  { %2143 = vmatprep.subr.bf16.mxu0 %v3042_v46  ;;  %2184 = vmatprep.subr.bf16.mxu1 %v3045_v47  ;;  %v3118_v45 = vld [vmem:[%s4238_s5 + $0x10] ss:$28 sps:$4 sm:$0xff]   ;;  %v3126_v47 = vld [vmem:[%s4238_s5 + $0x35c] ss:$28 sps:$4 sm:$0xff]  }
 0x17d   :  { %v3121_v46 = vld [vmem:[%s4238_s5 + $0x390] ss:$28 sps:$4 sm:$0xff]  }
 0x17f   :  { %2144 = vmatpush2.bf16.msra.mxu0 %v3040_v48  ;;  %2185 = vmatpush2.bf16.msra.mxu1 %v3043_v49  ;;  %v3129_v48 = vld [vmem:[%s4238_s5 + $0x6dc] ss:$28 sps:$4 sm:$0xff]  }
 0x180   :  { %2145 = vmatprep.subr.bf16.mxu0 %v3048_v50  ;;  %2186 = vmatprep.subr.bf16.mxu1 %v3051_v51  ;;  %v3124_v49 = vld [vmem:[%s4238_s5 + $0x358] ss:$28 sps:$4 sm:$0xff]   ;;  %v3132_v51 = vld [vmem:[%s4238_s5 + $0x324] ss:$28 sps:$4 sm:$0xff]  }
 0x181   :  { %v3127_v50 = vld [vmem:[%s4238_s5 + $0x6d8] ss:$28 sps:$4 sm:$0xff]  }
 0x183   :  { %2146 = vmatpush2.bf16.msra.mxu0 %v3046_v52  ;;  %2187 = vmatpush2.bf16.msra.mxu1 %v3049_v53  ;;  %v3135_v52 = vld [vmem:[%s4238_s5 + $0x6a4] ss:$28 sps:$4 sm:$0xff]  }
 0x184   :  { %2147 = vmatprep.subr.bf16.mxu0 %v3054_v54  ;;  %2188 = vmatprep.subr.bf16.mxu1 %v3057_v55  ;;  %v3130_v53 = vld [vmem:[%s4238_s5 + $0x320] ss:$28 sps:$4 sm:$0xff]   ;;  %v3138_v55 = vld [vmem:[%s4238_s5 + $0x2ec] ss:$28 sps:$4 sm:$0xff]  }
 0x185   :  { %v3133_v54 = vld [vmem:[%s4238_s5 + $0x6a0] ss:$28 sps:$4 sm:$0xff]  }
 0x187   :  { %2148 = vmatpush2.bf16.msra.mxu0 %v3052_v56  ;;  %2189 = vmatpush2.bf16.msra.mxu1 %v3055_v57  ;;  %v3141_v56 = vld [vmem:[%s4238_s5 + $0x66c] ss:$28 sps:$4 sm:$0xff]  }
 0x188   :  { %2149 = vmatprep.subr.bf16.mxu0 %v3060_v58  ;;  %2190 = vmatprep.subr.bf16.mxu1 %v3063_v59  ;;  %v3136_v57 = vld [vmem:[%s4238_s5 + $0x2e8] ss:$28 sps:$4 sm:$0xff]   ;;  %v3144_v59 = vld [vmem:[%s4238_s5 + $0x2b4] ss:$28 sps:$4 sm:$0xff]  }
 0x189   :  { %v3139_v58 = vld [vmem:[%s4238_s5 + $0x668] ss:$28 sps:$4 sm:$0xff]  }
 0x18b   :  { %2150 = vmatpush2.bf16.msra.mxu0 %v3058_v60  ;;  %2191 = vmatpush2.bf16.msra.mxu1 %v3061_v61  ;;  %v3147_v60 = vld [vmem:[%s4238_s5 + $0x634] ss:$28 sps:$4 sm:$0xff]  }
 0x18c   :  { %2151 = vmatprep.subr.bf16.mxu0 %v3066_v62  ;;  %2192 = vmatprep.subr.bf16.mxu1 %v3069_v1  ;;  %v3142_v61 = vld [vmem:[%s4238_s5 + $0x2b0] ss:$28 sps:$4 sm:$0xff]   ;;  %v3150_v1 = vld [vmem:[%s4238_s5 + $0x27c] ss:$28 sps:$4 sm:$0xff]  }
 0x18d   :  { %v3145_v62 = vld [vmem:[%s4238_s5 + $0x630] ss:$28 sps:$4 sm:$0xff]  }
 0x18f   :  { %2152 = vmatpush2.bf16.msra.mxu0 %v3064_v2  ;;  %2193 = vmatpush2.bf16.msra.mxu1 %v3067_v5  ;;  %v3153_v2 = vld [vmem:[%s4238_s5 + $0x5fc] ss:$28 sps:$4 sm:$0xff]  }
 0x190   :  { %2153 = vmatprep.subr.bf16.mxu0 %v3072_v7  ;;  %2194 = vmatprep.subr.bf16.mxu1 %v3075_v10  ;;  %v3148_v5 = vld [vmem:[%s4238_s5 + $0x278] ss:$28 sps:$4 sm:$0xff]   ;;  %v3156_v10 = vld [vmem:[%s4238_s5 + $0x244] ss:$28 sps:$4 sm:$0xff]  }
 0x191   :  { %v3151_v7 = vld [vmem:[%s4238_s5 + $0x5f8] ss:$28 sps:$4 sm:$0xff]  }
 0x193   :  { %2154 = vmatpush2.bf16.msra.mxu0 %v3070_v11  ;;  %2195 = vmatpush2.bf16.msra.mxu1 %v3073_v14  ;;  %v3159_v11 = vld [vmem:[%s4238_s5 + $0x5c4] ss:$28 sps:$4 sm:$0xff]  }
 0x194   :  { %2205 = vmatprep.subr.bf16.mxu0 %v3078_v15  ;;  %2246 = vmatprep.subr.bf16.mxu1 %v3081_v16  ;;  %v3154_v14 = vld [vmem:[%s4238_s5 + $0x240] ss:$28 sps:$4 sm:$0xff]   ;;  %v3162_v16 = vld [vmem:[%s4238_s5 + $0x20c] ss:$28 sps:$4 sm:$0xff]  }
 0x195   :  { %v3157_v15 = vld [vmem:[%s4238_s5 + $0x5c0] ss:$28 sps:$4 sm:$0xff]  }
 0x196   :  { %2156 = vmatmul.mubr.bf16.vlgmr.msra.gmra.mxu0 %v3723_v3  ;;  %2197 = vmatmul.mubr.bf16.vlgmr.msra.gmra.mxu1 %v3725_v4 }
 0x197   :  { %2206 = vmatpush1.bf16.msra.mxu0 %v3076_v17  ;;  %2237 = vmatprep.mubr.bf16.mxu0 %v3713_v63  ;;  %v3165_v17 = vld [vmem:[%s4238_s5 + $0x58c] ss:$28 sps:$4 sm:$0xff]  }
 0x198   :  { %2247 = vmatpush1.bf16.msra.mxu1 %v3079_v18  ;;  %2278 = vmatprep.mubr.bf16.mxu1 %v3715_v0  ;;  %v3160_v18 = vld [vmem:[%s4238_s5 + $0x208] ss:$28 sps:$4 sm:$0xff]  }
 0x199   :  { %2207 = vmatprep.subr.bf16.mxu0 %v3084_v19  ;;  %2248 = vmatprep.subr.bf16.mxu1 %v3087_v20  ;;  %v3163_v19 = vld [vmem:[%s4238_s5 + $0x588] ss:$28 sps:$4 sm:$0xff]   ;;  %v3168_v20 = vld [vmem:[%s4238_s5 + $0x1d4] ss:$28 sps:$4 sm:$0xff]  }
 0x19b   :  { %2208 = vmatpush1.bf16.msra.mxu0 %v3082_v21  ;;  %v3171_v21 = vld [vmem:[%s4238_s5 + $0x554] ss:$28 sps:$4 sm:$0xff]  }
 0x19c   :  { %2249 = vmatpush1.bf16.msra.mxu1 %v3085_v22  ;;  %2209 = vmatprep.subr.bf16.mxu0 %v3090_v23  ;;  %v3166_v22 = vld [vmem:[%s4238_s5 + $0x1d0] ss:$28 sps:$4 sm:$0xff]  }
 0x19d   :  { %2250 = vmatprep.subr.bf16.mxu1 %v3093_v24  ;;  %v3169_v23 = vld [vmem:[%s4238_s5 + $0x550] ss:$28 sps:$4 sm:$0xff]   ;;  %v3172_v24 = vld [vmem:[%s4238_s5 + $0x360] ss:$28 sps:$4 sm:$0xff]  }
 0x19f   :  { %2210 = vmatpush1.bf16.msra.mxu0 %v3088_v25  ;;  %v3173_v25 = vld [vmem:[%s4238_s5 + $0x6e0] ss:$28 sps:$4 sm:$0xff]  }
 0x1a0   :  { %2251 = vmatpush1.bf16.msra.mxu1 %v3091_v26  ;;  %2211 = vmatprep.subr.bf16.mxu0 %v3096_v27  ;;  %v3174_v26 = vld [vmem:[%s4238_s5 + $0x1a0] ss:$28 sps:$4 sm:$0xff]  }
 0x1a1   :  { %2252 = vmatprep.subr.bf16.mxu1 %v3099_v28  ;;  %v3175_v27 = vld [vmem:[%s4238_s5 + $0x520] ss:$28 sps:$4 sm:$0xff]   ;;  %v3176_v28 = vld [vmem:[%s4238_s5 + $0x328] ss:$28 sps:$4 sm:$0xff]  }
 0x1a3   :  { %2212 = vmatpush1.bf16.msra.mxu0 %v3094_v29  ;;  %v3177_v29 = vld [vmem:[%s4238_s5 + $0x6a8] ss:$28 sps:$4 sm:$0xff]  }
 0x1a4   :  { %2253 = vmatpush1.bf16.msra.mxu1 %v3097_v30  ;;  %2213 = vmatprep.subr.bf16.mxu0 %v3102_v31  ;;  %v3178_v30 = vld [vmem:[%s4238_s5 + $0x168] ss:$28 sps:$4 sm:$0xff]  }
 0x1a5   :  { %2254 = vmatprep.subr.bf16.mxu1 %v3105_v32  ;;  %v3179_v31 = vld [vmem:[%s4238_s5 + $0x4e8] ss:$28 sps:$4 sm:$0xff]   ;;  %v3180_v32 = vld [vmem:[%s4238_s5 + $0x2f0] ss:$28 sps:$4 sm:$0xff]  }
 0x1a7   :  { %2214 = vmatpush1.bf16.msra.mxu0 %v3100_v33  ;;  %v3181_v33 = vld [vmem:[%s4238_s5 + $0x670] ss:$28 sps:$4 sm:$0xff]  }
 0x1a8   :  { %2255 = vmatpush1.bf16.msra.mxu1 %v3103_v34  ;;  %2215 = vmatprep.subr.bf16.mxu0 %v3108_v35  ;;  %v3183_v34 = vld [vmem:[%s4238_s5 + $0x4b0] ss:$28 sps:$4 sm:$0xff]   ;;  %v3185_v35 = vld [vmem:[%s4238_s5 + $0x638] ss:$28 sps:$4 sm:$0xff]  }
 0x1a9   :  { %2256 = vmatprep.subr.bf16.mxu1 %v3111_v36  ;;  %v3186_v36 = vld [vmem:[%s4238_s5 + $0xf8] ss:$28 sps:$4 sm:$0xff]  }
 0x1ab   :  { %2216 = vmatpush1.bf16.msra.mxu0 %v3106_v37  ;;  %v3187_v37 = vld [vmem:[%s4238_s5 + $0x478] ss:$28 sps:$4 sm:$0xff]  }
 0x1ac   :  { %2257 = vmatpush1.bf16.msra.mxu1 %v3109_v38  ;;  %2217 = vmatprep.subr.bf16.mxu0 %v3114_v39  ;;  %v3188_v38 = vld [vmem:[%s4238_s5 + $0x280] ss:$28 sps:$4 sm:$0xff]  }
 0x1ad   :  { %2258 = vmatprep.subr.bf16.mxu1 %v3117_v40  ;;  %v3189_v39 = vld [vmem:[%s4238_s5 + $0x600] ss:$28 sps:$4 sm:$0xff]  }
 0x1ae   :  { %v3190_v40 = vld [vmem:[%s4238_s5 + $0xc0] ss:$28 sps:$4 sm:$0xff]  }
 0x1af   :  { %2218 = vmatpush1.bf16.msra.mxu0 %v3112_v41  ;;  %v3191_v41 = vld [vmem:[%s4238_s5 + $0x440] ss:$28 sps:$4 sm:$0xff]  }
 0x1b0   :  { %2259 = vmatpush1.bf16.msra.mxu1 %v3115_v42  ;;  %2219 = vmatprep.subr.bf16.mxu0 %v3120_v43  ;;  %v3192_v42 = vld [vmem:[%s4238_s5 + $0x248] ss:$28 sps:$4 sm:$0xff]  }
 0x1b1   :  { %2260 = vmatprep.subr.bf16.mxu1 %v3123_v44  ;;  %v3193_v43 = vld [vmem:[%s4238_s5 + $0x5c8] ss:$28 sps:$4 sm:$0xff]  }
 0x1b2   :  { %v3194_v44 = vld [vmem:[%s4238_s5 + $0x88] ss:$28 sps:$4 sm:$0xff]  }
 0x1b3   :  { %2220 = vmatpush1.bf16.msra.mxu0 %v3118_v45  ;;  %v3195_v45 = vld [vmem:[%s4238_s5 + $0x408] ss:$28 sps:$4 sm:$0xff]  }
 0x1b4   :  { %2261 = vmatpush1.bf16.msra.mxu1 %v3121_v46  ;;  %2221 = vmatprep.subr.bf16.mxu0 %v3126_v47  ;;  %v3196_v46 = vld [vmem:[%s4238_s5 + $0x210] ss:$28 sps:$4 sm:$0xff]  }
 0x1b5   :  { %2262 = vmatprep.subr.bf16.mxu1 %v3129_v48  ;;  %v3197_v47 = vld [vmem:[%s4238_s5 + $0x590] ss:$28 sps:$4 sm:$0xff]  }
 0x1b6   :  { %v3198_v48 = vld [vmem:[%s4238_s5 + $0x50] ss:$28 sps:$4 sm:$0xff]  }
 0x1b7   :  { %2222 = vmatpush2.bf16.msra.mxu0 %v3124_v49  ;;  %v3199_v49 = vld [vmem:[%s4238_s5 + $0x3d0] ss:$28 sps:$4 sm:$0xff]  }
 0x1b8   :  { %2263 = vmatpush2.bf16.msra.mxu1 %v3127_v50  ;;  %2223 = vmatprep.subr.bf16.mxu0 %v3132_v51  ;;  %v3200_v50 = vld [vmem:[%s4238_s5 + $0x1d8] ss:$28 sps:$4 sm:$0xff]  }
 0x1b9   :  { %2264 = vmatprep.subr.bf16.mxu1 %v3135_v52  ;;  %v3201_v51 = vld [vmem:[%s4238_s5 + $0x558] ss:$28 sps:$4 sm:$0xff]  }
 0x1ba   :  { %v3202_v52 = vld [vmem:[%s4238_s5 + $0x18] ss:$28 sps:$4 sm:$0xff]  }
 0x1bb   :  { %2224 = vmatpush2.bf16.msra.mxu0 %v3130_v53  ;;  %v3203_v53 = vld [vmem:[%s4238_s5 + $0x398] ss:$28 sps:$4 sm:$0xff]  }
 0x1bc   :  { %2265 = vmatpush2.bf16.msra.mxu1 %v3133_v54  ;;  %2225 = vmatprep.subr.bf16.mxu0 %v3138_v55  ;;  %v4214_v54 = vld [vmem:[%s4239_s6] sm:$0x7f] }
 0x1bd   :  { %2266 = vmatprep.subr.bf16.mxu1 %v3141_v56  ;;  %v857_v55 = vrot.slane %v4214_v54, %v3490_v8  ;;  %v861_v56 = vrot.slane %v4214_v54, %v3498_v12 }
 0x1bf   :  { %2226 = vmatpush2.bf16.msra.mxu0 %v3136_v57 }
 0x1c0   :  { %2267 = vmatpush2.bf16.msra.mxu1 %v3139_v58  ;;  %2227 = vmatprep.subr.bf16.mxu0 %v3144_v59 }
 0x1c1   :  { %2268 = vmatprep.subr.bf16.mxu1 %v3147_v60 }
 0x1c3   :  { %2228 = vmatpush2.bf16.msra.mxu0 %v3142_v61 }
 0x1c4   :  { %2269 = vmatpush2.bf16.msra.mxu1 %v3145_v62  ;;  %2229 = vmatprep.subr.bf16.mxu0 %v3150_v1 }
 0x1c5   :  { %2270 = vmatprep.subr.bf16.mxu1 %v3153_v2 }
 0x1c7   :  { %2230 = vmatpush2.bf16.msra.mxu0 %v3148_v5 }
 0x1c8   :  { %2271 = vmatpush2.bf16.msra.mxu1 %v3151_v7  ;;  %2231 = vmatprep.subr.bf16.mxu0 %v3156_v10 }
 0x1c9   :  { %2272 = vmatprep.subr.bf16.mxu1 %v3159_v11 }
 0x1cb   :  { %2232 = vmatpush2.bf16.msra.mxu0 %v3154_v14 }
 0x1cc   :  { %2273 = vmatpush2.bf16.msra.mxu1 %v3157_v15  ;;  %2233 = vmatprep.subr.bf16.mxu0 %v3162_v16 }
 0x1cd   :  { %2274 = vmatprep.subr.bf16.mxu1 %v3165_v17 }
 0x1cf   :  { %2234 = vmatpush2.bf16.msra.mxu0 %v3160_v18 }
 0x1d0   :  { %2275 = vmatpush2.bf16.msra.mxu1 %v3163_v19  ;;  %2235 = vmatprep.subr.bf16.mxu0 %v3168_v20  ;;  %v865_v19 = vrot.slane %v4214_v54, %v3493_v9  ;;  %v869_v20 = vrot.slane %v4214_v54, %v3501_v13 }
 0x1d1   :  { %2276 = vmatprep.subr.bf16.mxu1 %v3171_v21 }
 0x1d3   :  { %2236 = vmatpush2.bf16.msra.mxu0 %v3166_v22 }
 0x1d4   :  { %2277 = vmatpush2.bf16.msra.mxu1 %v3169_v23  ;;  %2739 = vmatprep.subr.bf16.mxu0 %v3172_v24 }
 0x1d5   :  { %2761 = vmatprep.subr.bf16.mxu1 %v3173_v25 }
 0x1d6   :  { %2238 = vmatmul.mubr.bf16.vlgmr.msra.gmra.mxu0 %v3723_v3 }
 0x1d7   :  { %2279 = vmatmul.mubr.bf16.vlgmr.msra.gmra.mxu1 %v3725_v4  ;;  %2740 = vmatpush3.bf16.msra.mxu0 %v3174_v26 }
 0x1d8   :  { %2319 = vmatprep.mubr.bf16.mxu0 %v3713_v63  ;;  %2762 = vmatpush3.bf16.msra.mxu1 %v3175_v27  ;;  %v3182_v63 = vld [vmem:[%s4238_s5 + $0x130] ss:$28 sps:$4 sm:$0xff]  }
 0x1d9   :  { %2359 = vmatprep.mubr.bf16.mxu1 %v3715_v0  ;;  %2741 = vmatprep.subr.bf16.mxu0 %v3176_v28  ;;  %v3184_v0 = vld [vmem:[%s4238_s5 + $0x2b8] ss:$28 sps:$4 sm:$0xff]   ;;  %s3242_s5 = smov [#allocation2]  }
 0x1da   :  { %2763 = vmatprep.subr.bf16.mxu1 %v3177_v29  ;;  %s2435_s6 = sshll.u32 %s3242_s5, 4  ;;  %s2436_s6 = int_to_ptr.vmem [resolvable:$true] %s2435_s6 }
 0x1db   :  { %2742 = vmatpush3.bf16.msra.mxu0 %v3178_v30  ;;  %s3218_s19 = scalar_lea.vmem %s2436_s6, 448  ;;  %p3223_p1 = scmp.lt.s32.totalorder %s2436_s6, %s2436_s6 }
 0x1dc   :  { %2764 = vmatpush3.bf16.msra.mxu1 %v3179_v31  ;;  %2743 = vmatprep.subr.bf16.mxu0 %v3180_v32  ;;  %p3219_p0 = scmp.ne.s32.totalorder %s2436_s6, %s3218_s19  ;;  %p3224_p2 = scmp.lt.s32.totalorder %s3218_s19, %s3218_s19 }
 0x1dd   :  { %2765 = vmatprep.subr.bf16.mxu1 %v3181_v33 }
 0x1de   :  { %p3225_p3 = por %p3224_p2, %p3223_p1 }
 0x1df   :  { %2744 = vmatpush3.bf16.msra.mxu0 %v3182_v63 }
 0x1e0   :  { %2766 = vmatpush3.bf16.msra.mxu1 %v3183_v34  ;;  %2745 = vmatprep.subr.bf16.mxu0 %v3184_v0  ;;  %p3226_p4 = pnand %p3225_p3, %p3219_p0 }
 0x1e1   :  { %2767 = vmatprep.subr.bf16.mxu1 %v3185_v35 }
 0x1e3   :  { %2746 = vmatpush3.bf16.msra.mxu0 %v3186_v36 }
 0x1e4   :  { %2768 = vmatpush3.bf16.msra.mxu1 %v3187_v37  ;;  %2747 = vmatprep.subr.bf16.mxu0 %v3188_v38  ;;  %v872_v38 = vsub.s32 4, %v3484_v6 }
 0x1e5   :  { %2769 = vmatprep.subr.bf16.mxu1 %v3189_v39  ;;  %v876_v39 = vsub.s32 5, %v3484_v6 }
 0x1e7   :  { %2748 = vmatpush3.bf16.msra.mxu0 %v3190_v40  ;;  %v873_v40 = vrot.slane %v4214_v54, %v872_v38 }
 0x1e8   :  { %2770 = vmatpush3.bf16.msra.mxu1 %v3191_v41  ;;  %2749 = vmatprep.subr.bf16.mxu0 %v3192_v42  ;;  %v877_v41 = vrot.slane %v4214_v54, %v876_v39 }
 0x1e9   :  { %2771 = vmatprep.subr.bf16.mxu1 %v3193_v43 }
 0x1eb   :  { %2750 = vmatpush3.bf16.msra.mxu0 %v3194_v44 }
 0x1ec   :  { %2772 = vmatpush3.bf16.msra.mxu1 %v3195_v45  ;;  %2751 = vmatprep.subr.bf16.mxu0 %v3196_v46 }
 0x1ed   :  { %2773 = vmatprep.subr.bf16.mxu1 %v3197_v47 }
 0x1ef   :  { %2752 = vmatpush3.bf16.msra.mxu0 %v3198_v48 }
 0x1f0   :  { %2774 = vmatpush3.bf16.msra.mxu1 %v3199_v49  ;;  %2753 = vmatprep.subr.bf16.mxu0 %v3200_v50 }
 0x1f1   :  { %2775 = vmatprep.subr.bf16.mxu1 %v3201_v51 }
 0x1f3   :  { %2754 = vmatpush3.bf16.msra.mxu0 %v3202_v52 }
 0x1f4   :  { %2776 = vmatpush3.bf16.msra.mxu1 %v3203_v53 }
 0x1f6   :  { %2320 = vmatmul.mubr.bf16.vlgmr.msra.gmra.mxu0 %v3723_v3 }
 0x1f7   :  { %2360 = vmatmul.mubr.bf16.vlgmr.msra.gmra.mxu1 %v3725_v4 }
 0x216   :  { %v2075_v57 = vpop.f32.mrf.mxu0  ;;  %v2116_v58 = vpop.f32.mrf.mxu1 }
 0x217   :  { %v2076_v59 = vadd.f32 %v2075_v57, %v857_v55 }
 0x218   :  { %v2077_v60 = vpop.f32.mrf.mxu0  ;;  %v2118_v61 = vpop.f32.mrf.mxu1 }
 0x219   :  { %v2117_v62 = vadd.f32 %v2116_v58, %v2076_v59  ;;  %v2078_v3 = vadd.f32 %v2077_v60, %v861_v56 }
 0x21a   :  { %v2079_v1 = vpop.f32.mrf.mxu0  ;;  %v2120_v4 = vpop.f32.mrf.mxu1 }
 0x21b   :  { %v2367_v2 = vmul.f32 0.5, %v2117_v62  ;;  %v2119_v5 = vadd.f32 %v2118_v61, %v2078_v3  ;;  %v880_v1 = vsub.s32 6, %v3484_v6 }
 0x21c   :  { %v2080_v7 = vpop.f32.mrf.mxu0  ;;  %v2121_v10 = vpop.f32.mrf.mxu1 }
 0x21d   :  { %3204 = vtanh.f32 %v2367_v2  ;;  %v2368_v11 = vmul.f32 0.5, %v2119_v5  ;;  %v881_v5 = vrot.slane %v4214_v54, %v880_v1 }
 0x21f   :  { %3206 = vtanh.f32 %v2368_v11 }
 0x22a   :  { %v3205_v8 = vpop.eup %3204 }
 0x22b   :  { %v2381_v14 = vmul.f32 0.5, %v3205_v8 }
 0x22c   :  { %v3207_v15 = vpop.eup %3206 }
 0x22d   :  { %v2382_v12 = vmul.f32 0.5, %v3207_v15  ;;  %v2388_v16 = vadd.f32 0.5, %v2381_v14 }
 0x22f   :  { %v2389_v17 = vadd.f32 0.5, %v2382_v12 }
 0x231   :  { %v2735_v18 = vpack.c.bf16 %v2389_v17, %v2388_v16 }
 0x233   :  { %2424 = vst [vmem:[#allocation2] sm:$0xff] %v2735_v18 }
 0x256   :  { %v2157_v21 = vpop.f32.mrf.mxu0  ;;  %v2198_v22 = vpop.f32.mrf.mxu1 }
 0x257   :  { %v2158_v23 = vadd.f32 %v2157_v21, %v865_v19 }
 0x258   :  { %v2159_v24 = vpop.f32.mrf.mxu0  ;;  %v2200_v25 = vpop.f32.mrf.mxu1 }
 0x259   :  { %v2199_v26 = vadd.f32 %v2198_v22, %v2158_v23  ;;  %v2160_v27 = vadd.f32 %v2159_v24, %v869_v20 }
 0x25a   :  { %v2161_v28 = vpop.f32.mrf.mxu0  ;;  %v2202_v29 = vpop.f32.mrf.mxu1 }
 0x25b   :  { %v2369_v30 = vmul.f32 0.5, %v2199_v26  ;;  %v2201_v31 = vadd.f32 %v2200_v25, %v2160_v27 }
 0x25c   :  { %v2162_v32 = vpop.f32.mrf.mxu0  ;;  %v2203_v33 = vpop.f32.mrf.mxu1 }
 0x25d   :  { %3208 = vtanh.f32 %v2369_v30  ;;  %v2370_v63 = vmul.f32 0.5, %v2201_v31 }
 0x25f   :  { %3210 = vtanh.f32 %v2370_v63 }
 0x26a   :  { %v3209_v9 = vpop.eup %3208 }
 0x26b   :  { %v2383_v34 = vmul.f32 0.5, %v3209_v9 }
 0x26c   :  { %v3211_v0 = vpop.eup %3210 }
 0x26d   :  { %v2384_v13 = vmul.f32 0.5, %v3211_v0  ;;  %v2390_v35 = vadd.f32 0.5, %v2383_v34 }
 0x26f   :  { %v2391_v36 = vadd.f32 0.5, %v2384_v13 }
 0x271   :  { %v2736_v37 = vpack.c.bf16 %v2391_v36, %v2390_v35 }
 0x273   :  { %2425 = vst [vmem:[#allocation2 + $0x8] sm:$0xff] %v2736_v37 }
 0x296   :  { %v2239_v42 = vpop.f32.mrf.mxu0 }
 0x297   :  { %v2240_v43 = vadd.f32 %v2239_v42, %v873_v40  ;;  %v2280_v44 = vpop.f32.mrf.mxu1 }
 0x298   :  { %v2241_v45 = vpop.f32.mrf.mxu0 }
 0x299   :  { %v2281_v46 = vadd.f32 %v2280_v44, %v2240_v43  ;;  %v2242_v47 = vadd.f32 %v2241_v45, %v877_v41  ;;  %v2282_v48 = vpop.f32.mrf.mxu1 }
 0x29a   :  { %v2243_v49 = vpop.f32.mrf.mxu0 }
 0x29b   :  { %v2371_v50 = vmul.f32 0.5, %v2281_v46  ;;  %v2283_v51 = vadd.f32 %v2282_v48, %v2242_v47  ;;  %v2284_v52 = vpop.f32.mrf.mxu1 }
 0x29c   :  { %v2244_v53 = vpop.f32.mrf.mxu0 }
 0x29d   :  { %3212 = vtanh.f32 %v2371_v50  ;;  %v2372_v55 = vmul.f32 0.5, %v2283_v51  ;;  %v2285_v56 = vpop.f32.mrf.mxu1 }
 0x29f   :  { %3214 = vtanh.f32 %v2372_v55 }
 0x2aa   :  { %v3213_v57 = vpop.eup %3212 }
 0x2ab   :  { %v2385_v58 = vmul.f32 0.5, %v3213_v57 }
 0x2ac   :  { %v3215_v59 = vpop.eup %3214 }
 0x2ad   :  { %v2386_v60 = vmul.f32 0.5, %v3215_v59  ;;  %v2392_v61 = vadd.f32 0.5, %v2385_v58 }
 0x2af   :  { %v2393_v62 = vadd.f32 0.5, %v2386_v60 }
 0x2b1   :  { %v2737_v3 = vpack.c.bf16 %v2393_v62, %v2392_v61 }
 0x2b3   :  { %2426 = vst [vmem:[#allocation2 + $0x10] sm:$0xff] %v2737_v3 }
 0x2b6   :  { %v2755_v4 = vpop.f32.mrf.mxu0 }
 0x2b7   :  { %v2777_v2 = vpop.f32.mrf.mxu1 }
 0x2b8   :  { %v2756_v7 = vpop.f32.mrf.mxu0 }
 0x2b9   :  { %v2757_v10 = vadd.f32 %v2756_v7, %v2755_v4  ;;  %v2778_v11 = vpop.f32.mrf.mxu1 }
 0x2ba   :  { %v2758_v8 = vpop.f32.mrf.mxu0  ;;  %v2779_v15 = vadd.f32 %v2778_v11, %v2777_v2 }
 0x2bb   :  { %v2322_v14 = vadd.f32 %v2757_v10, %v881_v5  ;;  %v2780_v12 = vpop.f32.mrf.mxu1 }
 0x2bc   :  { %v2759_v16 = vpop.f32.mrf.mxu0 }
 0x2bd   :  { %v2362_v17 = vadd.f32 %v2779_v15, %v2322_v14  ;;  %v2781_v18 = vpop.f32.mrf.mxu1 }
 0x2bf   :  { %v2373_v19 = vmul.f32 0.5, %v2362_v17 }
 0x2c1   :  { %3216 = vtanh.f32 %v2373_v19 }
 0x2ce   :  { %v3217_v20 = vpop.eup %3216 }
 0x2cf   :  { %v2387_v21 = vmul.f32 0.5, %v3217_v20 }
 0x2d1   :  { %v2394_v6 = vadd.f32 0.5, %v2387_v21 }
 0x2d3   :  { %v2738_v22 = vpack.c.bf16 %v2394_v6, %v2394_v6 }
 0x2d5   :  { %2428 = vst.msk [vmem:[#allocation2 + $0x18] sm:$0xf] %vm2427_vm0, %v2738_v22 }
 0x2d6   :  { %3229 = shalt.err (!%p3226_p4)
}
 0x2d7   :  { %2438 = dma.vmem_to_hbm [thread:$0]  %s2436_s6, 448, %s4240_s7, [#allocation3]  }
 0x2d8   :  { %3238 = dma.done.wait [#allocation3], 448  }
 0x2d9   :  { %3239 = vsyncadd [#allocation3], 4294966848 }
 0x2da   :  { %2442 = vsyncpa [#allocation3], 1 }

</bundles_post_ra>
